<compile_context>
chip_gen: v5e
topology: v5e:2x2
jax: 0.10.0
libtpu: 0.0.40
codegen_flags: <defaults>
</compile_context>

<pallas_src>
import functools
import math

import jax
import jax.numpy as jnp
from jax import lax
from jax.experimental import pallas as pl
from jax.experimental.pallas import tpu as pltpu


def vat_kernel(x_ref, r0_ref, w_ref, wt_ref, b_ref, loss_ref, *,
               xi, eps, vat_iter, num_classes, inv_n):
    Kp = w_ref.shape[1]

    x = x_ref[...]                        # (B, D)  f32
    w = w_ref[...]                        # (D, Kp) bf16
    wt = wt_ref[...]                      # (Kp, D) bf16 (pre-transposed W)
    b = b_ref[...]                        # (1, Kp) f32

    # mask selecting the real (unpadded) classes
    lane = lax.broadcasted_iota(jnp.int32, (1, Kp), 1)
    cls_mask = lane < num_classes         # (1, Kp) bool

    def logits_of(inp):                   # (B, D) f32 -> (B, Kp) f32
        return jnp.dot(inp.astype(jnp.bfloat16), w,
                       preferred_element_type=jnp.float32) + b

    def masked_softmax(z):                # softmax over real classes only
        z = jnp.where(cls_mask, z, -jnp.inf)
        m = jnp.max(z, axis=1, keepdims=True)
        e = jnp.exp(z - m)                # padded lanes -> exp(-inf) = 0
        return e / jnp.sum(e, axis=1, keepdims=True)

    def l2norm(v):                        # per-batch-row L2 normalization
        n = jnp.sqrt(jnp.sum(v * v, axis=1, keepdims=True))
        return v / (n + 1e-8)

    # pred = softmax(model(x))   (torch.no_grad forward)
    pred = masked_softmax(logits_of(x))                    # (B, Kp), padded = 0
    logpred = jnp.log(jnp.where(cls_mask, pred, 1.0))      # 0 on padded lanes
    g = (-inv_n) * pred                                    # loop-invariant dKL/ds

    # r = L2Norm(randn(x.shape) - 0.5)
    r = l2norm(r0_ref[...])

    # power iterations: r <- L2Norm( d kl_div / d r )     (unrolled, static)
    for _ in range(vat_iter):
        adv = x + xi * r
        s = masked_softmax(logits_of(adv))                 # (B, Kp)
        # softmax VJP:  dz_j = s_j * (g_j - sum_i g_i s_i)
        dz = s * (g - jnp.sum(g * s, axis=1, keepdims=True))
        # linear VJP:   gx = dz @ W^T  done as dz @ Wt (lane-dense output over D)
        gx = jnp.dot(dz.astype(jnp.bfloat16), wt,
                     preferred_element_type=jnp.float32)   # (B, D)
        r = l2norm(xi * gx)

    # loss = F.kl_div(softmax(model(x + eps*r)), pred, reduction='mean')
    # (faithfully reproduces the reference: probability, not log-prob, as input)
    s = masked_softmax(logits_of(x + eps * r))
    kl = pred * (logpred - s)                              # padded lanes == 0
    loss_ref[...] = jnp.sum(kl, axis=(0, 1), keepdims=True) * inv_n


def vat_loss(x_nchw, w, b, key, *, xi, eps, vat_iter):
    B = x_nchw.shape[0]
    D = math.prod(x_nchw.shape[1:])
    K = w.shape[1]
    Kp = ((K + 127) // 128) * 128          # lane-dense (padded) class dim

    x = x_nchw.reshape(B, D).astype(jnp.float32)
    # zero-padded weights/bias; weights stored in bf16 for the MXU
    w_p = jnp.zeros((D, Kp), jnp.float32).at[:, :K].set(w).astype(jnp.bfloat16)
    wt_p = jnp.transpose(w_p)              # (Kp, D) bf16, transposed once
    b_p = jnp.zeros((1, Kp), jnp.float32).at[:, :K].set(jnp.reshape(b, (1, K)))

    # r = randn(x.shape) - 0.5  (same random stream as the reference setup;
    # the L2 normalization is done inside the fused kernel)
    r0 = (jax.random.normal(key, x_nchw.shape, dtype=jnp.float32) - 0.5).reshape(B, D)

    inv_n = 1.0 / float(B * K)             # 'mean' reduction over all B*K elems

    vmem = pl.BlockSpec(memory_space=pltpu.MemorySpace.VMEM)
    kernel = functools.partial(vat_kernel, xi=float(xi), eps=float(eps),
                               vat_iter=int(vat_iter), num_classes=int(K),
                               inv_n=inv_n)

    # Single fused pallas_call: whole-array VMEM blocks, no grid (working set
    # < 2 MiB, far under VMEM on v5e/v6e/v7x), everything stays on-chip.
    loss = pl.pallas_call(
        kernel,
        out_shape=jax.ShapeDtypeStruct((1, 1), jnp.float32),
        in_specs=[vmem, vmem, vmem, vmem, vmem],
        out_specs=vmem,
    )(x, r0, w_p, wt_p, b_p)
    return loss[0, 0]


if __name__ == "__main__":
    key = jax.random.PRNGKey(0)
    k_x, k_w, k_r = jax.random.split(key, 3)

    B, Cin, H, W = 2, 4, 16, 16
    num_classes = 10
    D = Cin * H * W

    # deterministic synthetic inputs + model parameters
    x = jax.random.normal(k_x, (B, Cin, H, W), dtype=jnp.float32)
    w = 0.02 * jax.random.normal(k_w, (D, num_classes), dtype=jnp.float32)
    b = jnp.zeros((1, num_classes), dtype=jnp.float32)

    # args: vat_xi=1.0, vat_eps=1.0, vat_iter=2
    loss = vat_loss(x, w, b, k_r, xi=1.0, eps=1.0, vat_iter=2)
    jax.block_until_ready(loss)
    print("KERNEL_OK")
</pallas_src>

<mosaic_0001>
module attributes {stable_mosaic.version = 11 : i64} {
  func.func @vat_kernel(%arg0: memref<2x1024xf32, #tpu.memory_space<vmem>>, %arg1: memref<2x1024xf32, #tpu.memory_space<vmem>>, %arg2: memref<1024x128xbf16, #tpu.memory_space<vmem>>, %arg3: memref<128x1024xbf16, #tpu.memory_space<vmem>>, %arg4: memref<1x128xf32, #tpu.memory_space<vmem>>, %arg5: memref<1x1xf32, #tpu.memory_space<vmem>>) attributes {dimension_semantics = [], scalar_prefetch = 0 : i64, scratch_operands = 0 : i64, tpu.core_type = #tpu.core_type<tc>} {
    %c0 = arith.constant 0 : index
    %c0_0 = arith.constant 0 : index
    %0 = vector.load %arg0[%c0, %c0_0] : memref<2x1024xf32, #tpu.memory_space<vmem>>, vector<2x1024xf32>
    %c0_1 = arith.constant 0 : index
    %c0_2 = arith.constant 0 : index
    %1 = vector.load %arg2[%c0_1, %c0_2] : memref<1024x128xbf16, #tpu.memory_space<vmem>>, vector<1024x128xbf16>
    %c0_3 = arith.constant 0 : index
    %c0_4 = arith.constant 0 : index
    %2 = vector.load %arg3[%c0_3, %c0_4] : memref<128x1024xbf16, #tpu.memory_space<vmem>>, vector<128x1024xbf16>
    %c0_5 = arith.constant 0 : index
    %c0_6 = arith.constant 0 : index
    %3 = vector.load %arg4[%c0_5, %c0_6] : memref<1x128xf32, #tpu.memory_space<vmem>>, vector<1x128xf32>
    %4 = tpu.iota {dimensions = array<i32: 1>} : vector<1x128xi32>
    %c10_i32 = arith.constant 10 : i32
    %5 = vector.broadcast %c10_i32 : i32 to vector<1x128xi32>
    %6 = arith.cmpi slt, %4, %5 : vector<1x128xi32>
    %7 = arith.truncf %0 : vector<2x1024xf32> to vector<2x1024xbf16>
    %cst = arith.constant dense<0.000000e+00> : vector<2x128xf32>
    %8 = tpu.matmul %7, %1, %cst {dimension_numbers = #tpu.dot_dimension_numbers<[1], [0], [0], [1], [0, 0, 1, 1], [], []>} : vector<2x1024xbf16>, vector<1024x128xbf16>, vector<2x128xf32> -> vector<2x128xf32>
    %9 = vector.broadcast %3 : vector<1x128xf32> to vector<2x128xf32>
    %10 = arith.addf %8, %9 : vector<2x128xf32>
    %cst_7 = arith.constant 0xFF800000 : f32
    %11 = vector.shape_cast %6 : vector<1x128xi1> to vector<1x128xi1>
    %12 = vector.broadcast %11 : vector<1x128xi1> to vector<2x128xi1>
    %13 = vector.broadcast %cst_7 : f32 to vector<2x128xf32>
    %14 = arith.select %12, %10, %13 : vector<2x128xi1>, vector<2x128xf32>
    %cst_8 = arith.constant dense<0xFF800000> : vector<2xf32>
    %15 = vector.multi_reduction <maximumf>, %14, %cst_8 [1] : vector<2x128xf32> to vector<2xf32>
    %16 = vector.shape_cast %15 : vector<2xf32> to vector<2x1xf32>
    %17 = vector.broadcast %16 : vector<2x1xf32> to vector<2x128xf32>
    %18 = arith.subf %14, %17 : vector<2x128xf32>
    %19 = math.exp %18 : vector<2x128xf32>
    %cst_9 = arith.constant dense<0.000000e+00> : vector<2xf32>
    %20 = vector.multi_reduction <add>, %19, %cst_9 [1] : vector<2x128xf32> to vector<2xf32>
    %21 = vector.shape_cast %20 : vector<2xf32> to vector<2x1xf32>
    %22 = vector.broadcast %21 : vector<2x1xf32> to vector<2x128xf32>
    %23 = arith.divf %19, %22 : vector<2x128xf32>
    %cst_10 = arith.constant 1.000000e+00 : f32
    %24 = vector.shape_cast %6 : vector<1x128xi1> to vector<1x128xi1>
    %25 = vector.broadcast %24 : vector<1x128xi1> to vector<2x128xi1>
    %26 = vector.broadcast %cst_10 : f32 to vector<2x128xf32>
    %27 = arith.select %25, %23, %26 : vector<2x128xi1>, vector<2x128xf32>
    %28 = math.log %27 : vector<2x128xf32>
    %cst_11 = arith.constant -5.000000e-02 : f32
    %29 = vector.broadcast %cst_11 : f32 to vector<2x128xf32>
    %30 = arith.mulf %29, %23 : vector<2x128xf32>
    %c0_12 = arith.constant 0 : index
    %c0_13 = arith.constant 0 : index
    %31 = vector.load %arg1[%c0_12, %c0_13] : memref<2x1024xf32, #tpu.memory_space<vmem>>, vector<2x1024xf32>
    %32 = arith.mulf %31, %31 : vector<2x1024xf32>
    %cst_14 = arith.constant dense<0.000000e+00> : vector<2xf32>
    %33 = vector.multi_reduction <add>, %32, %cst_14 [1] : vector<2x1024xf32> to vector<2xf32>
    %34 = vector.shape_cast %33 : vector<2xf32> to vector<2x1xf32>
    %35 = math.sqrt %34 : vector<2x1xf32>
    %cst_15 = arith.constant 9.99999993E-9 : f32
    %36 = vector.broadcast %cst_15 : f32 to vector<2x1xf32>
    %37 = arith.addf %35, %36 : vector<2x1xf32>
    %38 = vector.broadcast %37 : vector<2x1xf32> to vector<2x1024xf32>
    %39 = arith.divf %31, %38 : vector<2x1024xf32>
    %cst_16 = arith.constant 1.000000e+00 : f32
    %40 = vector.broadcast %cst_16 : f32 to vector<2x1024xf32>
    %41 = arith.mulf %40, %39 : vector<2x1024xf32>
    %42 = arith.addf %0, %41 : vector<2x1024xf32>
    %43 = arith.truncf %42 : vector<2x1024xf32> to vector<2x1024xbf16>
    %cst_17 = arith.constant dense<0.000000e+00> : vector<2x128xf32>
    %44 = tpu.matmul %43, %1, %cst_17 {dimension_numbers = #tpu.dot_dimension_numbers<[1], [0], [0], [1], [0, 0, 1, 1], [], []>} : vector<2x1024xbf16>, vector<1024x128xbf16>, vector<2x128xf32> -> vector<2x128xf32>
    %45 = vector.broadcast %3 : vector<1x128xf32> to vector<2x128xf32>
    %46 = arith.addf %44, %45 : vector<2x128xf32>
    %cst_18 = arith.constant 0xFF800000 : f32
    %47 = vector.shape_cast %6 : vector<1x128xi1> to vector<1x128xi1>
    %48 = vector.broadcast %47 : vector<1x128xi1> to vector<2x128xi1>
    %49 = vector.broadcast %cst_18 : f32 to vector<2x128xf32>
    %50 = arith.select %48, %46, %49 : vector<2x128xi1>, vector<2x128xf32>
    %cst_19 = arith.constant dense<0xFF800000> : vector<2xf32>
    %51 = vector.multi_reduction <maximumf>, %50, %cst_19 [1] : vector<2x128xf32> to vector<2xf32>
    %52 = vector.shape_cast %51 : vector<2xf32> to vector<2x1xf32>
    %53 = vector.broadcast %52 : vector<2x1xf32> to vector<2x128xf32>
    %54 = arith.subf %50, %53 : vector<2x128xf32>
    %55 = math.exp %54 : vector<2x128xf32>
    %cst_20 = arith.constant dense<0.000000e+00> : vector<2xf32>
    %56 = vector.multi_reduction <add>, %55, %cst_20 [1] : vector<2x128xf32> to vector<2xf32>
    %57 = vector.shape_cast %56 : vector<2xf32> to vector<2x1xf32>
    %58 = vector.broadcast %57 : vector<2x1xf32> to vector<2x128xf32>
    %59 = arith.divf %55, %58 : vector<2x128xf32>
    %60 = arith.mulf %30, %59 : vector<2x128xf32>
    %cst_21 = arith.constant dense<0.000000e+00> : vector<2xf32>
    %61 = vector.multi_reduction <add>, %60, %cst_21 [1] : vector<2x128xf32> to vector<2xf32>
    %62 = vector.shape_cast %61 : vector<2xf32> to vector<2x1xf32>
    %63 = vector.broadcast %62 : vector<2x1xf32> to vector<2x128xf32>
    %64 = arith.subf %30, %63 : vector<2x128xf32>
    %65 = arith.mulf %59, %64 : vector<2x128xf32>
    %66 = arith.truncf %65 : vector<2x128xf32> to vector<2x128xbf16>
    %cst_22 = arith.constant dense<0.000000e+00> : vector<2x1024xf32>
    %67 = tpu.matmul %66, %2, %cst_22 {dimension_numbers = #tpu.dot_dimension_numbers<[1], [0], [0], [1], [0, 0, 1, 1], [], []>} : vector<2x128xbf16>, vector<128x1024xbf16>, vector<2x1024xf32> -> vector<2x1024xf32>
    %cst_23 = arith.constant 1.000000e+00 : f32
    %68 = vector.broadcast %cst_23 : f32 to vector<2x1024xf32>
    %69 = arith.mulf %68, %67 : vector<2x1024xf32>
    %70 = arith.mulf %69, %69 : vector<2x1024xf32>
    %cst_24 = arith.constant dense<0.000000e+00> : vector<2xf32>
    %71 = vector.multi_reduction <add>, %70, %cst_24 [1] : vector<2x1024xf32> to vector<2xf32>
    %72 = vector.shape_cast %71 : vector<2xf32> to vector<2x1xf32>
    %73 = math.sqrt %72 : vector<2x1xf32>
    %cst_25 = arith.constant 9.99999993E-9 : f32
    %74 = vector.broadcast %cst_25 : f32 to vector<2x1xf32>
    %75 = arith.addf %73, %74 : vector<2x1xf32>
    %76 = vector.broadcast %75 : vector<2x1xf32> to vector<2x1024xf32>
    %77 = arith.divf %69, %76 : vector<2x1024xf32>
    %cst_26 = arith.constant 1.000000e+00 : f32
    %78 = vector.broadcast %cst_26 : f32 to vector<2x1024xf32>
    %79 = arith.mulf %78, %77 : vector<2x1024xf32>
    %80 = arith.addf %0, %79 : vector<2x1024xf32>
    %81 = arith.truncf %80 : vector<2x1024xf32> to vector<2x1024xbf16>
    %cst_27 = arith.constant dense<0.000000e+00> : vector<2x128xf32>
    %82 = tpu.matmul %81, %1, %cst_27 {dimension_numbers = #tpu.dot_dimension_numbers<[1], [0], [0], [1], [0, 0, 1, 1], [], []>} : vector<2x1024xbf16>, vector<1024x128xbf16>, vector<2x128xf32> -> vector<2x128xf32>
    %83 = vector.broadcast %3 : vector<1x128xf32> to vector<2x128xf32>
    %84 = arith.addf %82, %83 : vector<2x128xf32>
    %cst_28 = arith.constant 0xFF800000 : f32
    %85 = vector.shape_cast %6 : vector<1x128xi1> to vector<1x128xi1>
    %86 = vector.broadcast %85 : vector<1x128xi1> to vector<2x128xi1>
    %87 = vector.broadcast %cst_28 : f32 to vector<2x128xf32>
    %88 = arith.select %86, %84, %87 : vector<2x128xi1>, vector<2x128xf32>
    %cst_29 = arith.constant dense<0xFF800000> : vector<2xf32>
    %89 = vector.multi_reduction <maximumf>, %88, %cst_29 [1] : vector<2x128xf32> to vector<2xf32>
    %90 = vector.shape_cast %89 : vector<2xf32> to vector<2x1xf32>
    %91 = vector.broadcast %90 : vector<2x1xf32> to vector<2x128xf32>
    %92 = arith.subf %88, %91 : vector<2x128xf32>
    %93 = math.exp %92 : vector<2x128xf32>
    %cst_30 = arith.constant dense<0.000000e+00> : vector<2xf32>
    %94 = vector.multi_reduction <add>, %93, %cst_30 [1] : vector<2x128xf32> to vector<2xf32>
    %95 = vector.shape_cast %94 : vector<2xf32> to vector<2x1xf32>
    %96 = vector.broadcast %95 : vector<2x1xf32> to vector<2x128xf32>
    %97 = arith.divf %93, %96 : vector<2x128xf32>
    %98 = arith.mulf %30, %97 : vector<2x128xf32>
    %cst_31 = arith.constant dense<0.000000e+00> : vector<2xf32>
    %99 = vector.multi_reduction <add>, %98, %cst_31 [1] : vector<2x128xf32> to vector<2xf32>
    %100 = vector.shape_cast %99 : vector<2xf32> to vector<2x1xf32>
    %101 = vector.broadcast %100 : vector<2x1xf32> to vector<2x128xf32>
    %102 = arith.subf %30, %101 : vector<2x128xf32>
    %103 = arith.mulf %97, %102 : vector<2x128xf32>
    %104 = arith.truncf %103 : vector<2x128xf32> to vector<2x128xbf16>
    %cst_32 = arith.constant dense<0.000000e+00> : vector<2x1024xf32>
    %105 = tpu.matmul %104, %2, %cst_32 {dimension_numbers = #tpu.dot_dimension_numbers<[1], [0], [0], [1], [0, 0, 1, 1], [], []>} : vector<2x128xbf16>, vector<128x1024xbf16>, vector<2x1024xf32> -> vector<2x1024xf32>
    %cst_33 = arith.constant 1.000000e+00 : f32
    %106 = vector.broadcast %cst_33 : f32 to vector<2x1024xf32>
    %107 = arith.mulf %106, %105 : vector<2x1024xf32>
    %108 = arith.mulf %107, %107 : vector<2x1024xf32>
    %cst_34 = arith.constant dense<0.000000e+00> : vector<2xf32>
    %109 = vector.multi_reduction <add>, %108, %cst_34 [1] : vector<2x1024xf32> to vector<2xf32>
    %110 = vector.shape_cast %109 : vector<2xf32> to vector<2x1xf32>
    %111 = math.sqrt %110 : vector<2x1xf32>
    %cst_35 = arith.constant 9.99999993E-9 : f32
    %112 = vector.broadcast %cst_35 : f32 to vector<2x1xf32>
    %113 = arith.addf %111, %112 : vector<2x1xf32>
    %114 = vector.broadcast %113 : vector<2x1xf32> to vector<2x1024xf32>
    %115 = arith.divf %107, %114 : vector<2x1024xf32>
    %cst_36 = arith.constant 1.000000e+00 : f32
    %116 = vector.broadcast %cst_36 : f32 to vector<2x1024xf32>
    %117 = arith.mulf %116, %115 : vector<2x1024xf32>
    %118 = arith.addf %0, %117 : vector<2x1024xf32>
    %119 = arith.truncf %118 : vector<2x1024xf32> to vector<2x1024xbf16>
    %cst_37 = arith.constant dense<0.000000e+00> : vector<2x128xf32>
    %120 = tpu.matmul %119, %1, %cst_37 {dimension_numbers = #tpu.dot_dimension_numbers<[1], [0], [0], [1], [0, 0, 1, 1], [], []>} : vector<2x1024xbf16>, vector<1024x128xbf16>, vector<2x128xf32> -> vector<2x128xf32>
    %121 = vector.broadcast %3 : vector<1x128xf32> to vector<2x128xf32>
    %122 = arith.addf %120, %121 : vector<2x128xf32>
    %cst_38 = arith.constant 0xFF800000 : f32
    %123 = vector.shape_cast %6 : vector<1x128xi1> to vector<1x128xi1>
    %124 = vector.broadcast %123 : vector<1x128xi1> to vector<2x128xi1>
    %125 = vector.broadcast %cst_38 : f32 to vector<2x128xf32>
    %126 = arith.select %124, %122, %125 : vector<2x128xi1>, vector<2x128xf32>
    %cst_39 = arith.constant dense<0xFF800000> : vector<2xf32>
    %127 = vector.multi_reduction <maximumf>, %126, %cst_39 [1] : vector<2x128xf32> to vector<2xf32>
    %128 = vector.shape_cast %127 : vector<2xf32> to vector<2x1xf32>
    %129 = vector.broadcast %128 : vector<2x1xf32> to vector<2x128xf32>
    %130 = arith.subf %126, %129 : vector<2x128xf32>
    %131 = math.exp %130 : vector<2x128xf32>
    %cst_40 = arith.constant dense<0.000000e+00> : vector<2xf32>
    %132 = vector.multi_reduction <add>, %131, %cst_40 [1] : vector<2x128xf32> to vector<2xf32>
    %133 = vector.shape_cast %132 : vector<2xf32> to vector<2x1xf32>
    %134 = vector.broadcast %133 : vector<2x1xf32> to vector<2x128xf32>
    %135 = arith.divf %131, %134 : vector<2x128xf32>
    %136 = arith.subf %28, %135 : vector<2x128xf32>
    %137 = arith.mulf %23, %136 : vector<2x128xf32>
    %138 = vector.shape_cast %137 : vector<2x128xf32> to vector<1x2x128xf32>
    %cst_41 = arith.constant dense<0.000000e+00> : vector<1xf32>
    %139 = vector.multi_reduction <add>, %138, %cst_41 [1, 2] : vector<1x2x128xf32> to vector<1xf32>
    %140 = vector.shape_cast %139 : vector<1xf32> to vector<1x1x1xf32>
    %141 = vector.extract %140[0, 0, 0] : f32 from vector<1x1x1xf32>
    %142 = vector.broadcast %141 : f32 to vector<1x1xf32>
    %cst_42 = arith.constant 5.000000e-02 : f32
    %143 = vector.broadcast %cst_42 : f32 to vector<1x1xf32>
    %144 = arith.mulf %142, %143 : vector<1x1xf32>
    %c0_43 = arith.constant 0 : index
    %c0_44 = arith.constant 0 : index
    %145 = vector.load %arg5[%c0_43, %c0_44] : memref<1x1xf32, #tpu.memory_space<vmem>>, vector<1x1xf32>
    tpu.vector_store %arg5[%c0_43, %c0_44], %144 {strides = array<i32>} : memref<1x1xf32, #tpu.memory_space<vmem>>, vector<1x1xf32>,
    return
  }
}

</mosaic_0001>

<bundles_post_ra>
// kernel: tpu_custom_call.1
= control target key start
LH: loop header
LB: loop body
LE: loop exit
PB: predicated region body
PF: predicated region fallthrough
CT: control target
= control target key end

     0   :  { %10 = vsyncpa [#allocation3], 0  ;;  %s4064_s0 = inlined_call_operand.hbm [shape: f32[2,1024], index: 0, kind: input, shape index: {}]   ;;  %s4065_s1 = inlined_call_operand.hbm [shape: f32[2,1024], index: 1, kind: input, shape index: {}]   ;;  %s4066_s2 = inlined_call_operand.hbm [shape: bf16[1024,128], index: 2, kind: input, shape index: {}]   ;;  %s4067_s3 = inlined_call_operand.hbm [shape: bf16[128,1024], index: 3, kind: input, shape index: {}]   ;;  %s4068_s4 = inlined_call_operand.vmem [shape: f32[1,128], index: 4, kind: input, shape index: {}]   ;;  %s4069_s5 = inlined_call_operand.hbm [shape: f32[1,1], index: 5, kind: output, shape index: {}]  }
   0x1   :  { %11 = vsyncpa [#allocation6], 0 }
   0x2   :  { %12 = vsyncpa [#allocation9], 0  ;;  %s30_s20 = sshll.u32 %s4065_s1, 4  ;;  %s31_s20 = int_to_ptr.hbm [resolvable:$true] %s30_s20 }
   0x3   :  { %13 = vsyncpa [#allocation4], 0  ;;  %s3006_s21 = smov [#allocation5]   ;;  %s19_s25 = sshll.u32 %s4064_s0, 4  ;;  %s20_s25 = int_to_ptr.hbm [resolvable:$true] %s19_s25 }
   0x4   :  { %s32_s22 = sshll.u32 %s3006_s21, 4  ;;  %s3007_s26 = smov [#allocation2]   ;;  %s33_s22 = int_to_ptr.vmem [resolvable:$true] %s32_s22 }
   0x5   :  { %35 = dma.hbm_to_vmem [thread:$0]  %s31_s20, 256, %s33_s22, [#allocation6]  }
   0x6   :  { %s21_s27 = sshll.u32 %s3007_s26, 4  ;;  %s40_s30 = sshll.u32 %s4066_s2, 4  ;;  %s22_s27 = int_to_ptr.vmem [resolvable:$true] %s21_s27  ;;  %s41_s30 = int_to_ptr.hbm [resolvable:$true] %s40_s30 }
   0x7   :  { %24 = dma.hbm_to_vmem [thread:$0]  %s20_s25, 256, %s22_s27, [#allocation3]  }
   0x8   :  { %s3008_s1 = smov [#allocation7]   ;;  %s53_s9 = sshll.u32 %s4067_s3, 4  ;;  %s54_s9 = int_to_ptr.hbm [resolvable:$true] %s53_s9 }
   0x9   :  { %s42_s6 = sshll.u32 %s3008_s1, 4  ;;  %s3009_s10 = smov 64   ;;  %s43_s6 = int_to_ptr.vmem [resolvable:$true] %s42_s6 }
   0xa   :  { %s3010_s0 = smov 4   ;;  %s3011_s11 = smov [#allocation8]  }
   0xb   :  { %48 = dma.hbm_to_vmem [thread:$0]  %s41_s30, 8192, %s43_s6, [#allocation6], %s3009_s10, %s3009_s10, %s3010_s0  }
   0xc   :  { %s55_s12 = sshll.u32 %s3011_s11, 4  ;;  %s3012_s13 = smov 512   ;;  %s56_s12 = int_to_ptr.vmem [resolvable:$true] %s55_s12 }
   0xd   :  { %s3013_s14 = smov 32  }
   0xe   :  { %61 = dma.hbm_to_vmem [thread:$0]  %s54_s9, 8192, %s56_s12, [#allocation9], %s3012_s13, %s3012_s13, %s3013_s14  }
   0xf   :  { %2998 = dma.done.wait [#allocation3], 256  }
  0x10   :  { %2999 = vsyncadd [#allocation3], 4294967040 }
  0x11   :  { %3000 = dma.done.wait [#allocation6], 8448  }
  0x12   :  { %3001 = vsyncadd [#allocation6], 4294958848 }
  0x13   :  { %3002 = dma.done.wait [#allocation9], 8192  }
  0x14   :  { %3003 = vsyncadd [#allocation9], 4294959104  ;;  %v3058_v0 = vld [vmem:[#allocation7 + $0xb8] sm:$0xff]  ;;  %v3068_v4 = vld [vmem:[#allocation7 + $0xb0] sm:$0xff]  ;;  %vm801_vm0 = vcmask 1041408   ;;  %s2118_s20 = sshll.u32 %s4069_s5, 4  ;;  %s2119_s20 = int_to_ptr.hbm [resolvable:$true] %s2118_s20 }
  0x15   :  { %v3060_v1 = vld [vmem:[#allocation7 + $0x38] sm:$0xff]  ;;  %720 = vmatpush.bf16.msra.mxu2 %v3058_v0  ;;  %v3070_v5 = vld [vmem:[#allocation7 + $0x30] sm:$0xff]  ;;  %v3080_v8 = vld [vmem:[#allocation7 + $0xa8] sm:$0xff] }
  0x16   :  { %v3062_v2 = vld [vmem:[#allocation7 + $0xf8] sm:$0xff]  ;;  %694 = vmatpush.bf16.msra.mxu0 %v3060_v1  ;;  %v3074_v6 = vld [vmem:[#allocation7 + $0xf0] sm:$0xff]  ;;  %v3082_v9 = vld [vmem:[#allocation7 + $0x28] sm:$0xff] }
  0x17   :  { %v3064_v3 = vld [vmem:[#allocation7 + $0x78] sm:$0xff]  ;;  %733 = vmatpush.bf16.msra.mxu3 %v3062_v2  ;;  %v3076_v7 = vld [vmem:[#allocation7 + $0x70] sm:$0xff]  ;;  %v3086_v10 = vld [vmem:[#allocation7 + $0xe8] sm:$0xff] }
  0x18   :  { %707 = vmatpush.bf16.msra.mxu1 %v3064_v3  ;;  %v3088_v11 = vld [vmem:[#allocation7 + $0x68] sm:$0xff]  ;;  %v3090_v12 = vld [vmem:[#allocation7 + $0xa0] sm:$0xff]  ;;  %v3110_v18 = vld [vmem:[#allocation7 + $0x98] sm:$0xff] }
  0x19   :  { %721 = vmatpush.bf16.msra.mxu2 %v3068_v4  ;;  %v3094_v13 = vld [vmem:[#allocation7 + $0x20] sm:$0xff]  ;;  %v3098_v15 = vld [vmem:[#allocation2 + $0x8] sm:$0xff]  ;;  %v3112_v19 = vld [vmem:[#allocation7 + $0x18] sm:$0xff] }
  0x1a   :  { %695 = vmatpush.bf16.msra.mxu0 %v3070_v5  ;;  %v3096_v14 = vld [vmem:[#allocation2] sm:$0xff]  ;;  %4185 = vst [vmem:[#allocation16_spill] sm:$0xff] %v3098_v15  ;;  %v3116_v20 = vld [vmem:[#allocation7 + $0xd8] sm:$0xff]  ;;  %v3120_v22 = vld [vmem:[#allocation5] sm:$0xff] }
  0x1b   :  { %734 = vmatpush.bf16.msra.mxu3 %v3074_v6  ;;  %4184 = vst [vmem:[#allocation15_spill] sm:$0xff] %v3096_v14  ;;  %v3102_v16 = vld [vmem:[#allocation7 + $0xe0] sm:$0xff]  ;;  %v3118_v21 = vld [vmem:[#allocation7 + $0x58] sm:$0xff]  ;;  %v3122_v23 = vld [vmem:[#allocation7 + $0x90] sm:$0xff]  ;;  %v832_v30 = vmul.f32 %v3120_v22, %v3120_v22 }
  0x1c   :  { %708 = vmatpush.bf16.msra.mxu1 %v3076_v7  ;;  %v3104_v17 = vld [vmem:[#allocation7 + $0x60] sm:$0xff]  ;;  %280 = vst [vmem:[#allocation1] ss:$4 sm:$0xff] %v3096_v14  ;;  %v3124_v24 = vld [vmem:[#allocation5 + $0x8] sm:$0xff]  ;;  %v3126_v25 = vld [vmem:[#allocation7 + $0x10] sm:$0xff] }
  0x1d   :  { %722 = vmatpush.bf16.msra.mxu2 %v3080_v8  ;;  %282 = vst [vmem:[#allocation1 + $0x20] ss:$4 sm:$0xff] %v3098_v15  ;;  %v3128_v26 = vld [vmem:[#allocation7 + $0xd0] sm:$0xff]  ;;  %v833_v33 = vmul.f32 %v3124_v24, %v3124_v24  ;;  %v3152_v38 = vld [vmem:[#allocation7 + $0x88] sm:$0xff]  ;;  %v3164_v42 = vld [vmem:[#allocation7 + $0x80] sm:$0xff] }
  0x1e   :  { %696 = vmatpush.bf16.msra.mxu0 %v3082_v9  ;;  %4186 = vst [vmem:[#allocation17_spill] sm:$0xff] %v3120_v22  ;;  %v3130_v27 = vld [vmem:[#allocation7 + $0x50] sm:$0xff]  ;;  %v3154_v39 = vld [vmem:[#allocation7 + $0x8] sm:$0xff]  ;;  %v3166_v43 = vld [vmem:[#allocation7] sm:$0xff] }
  0x1f   :  { %735 = vmatpush.bf16.msra.mxu3 %v3086_v10  ;;  %4187 = vst [vmem:[#allocation18_spill] sm:$0xff] %v3124_v24  ;;  %v3158_v40 = vld [vmem:[#allocation7 + $0xc8] sm:$0xff]  ;;  %v3170_v44 = vld [vmem:[#allocation7 + $0x1b8] sm:$0xff]  ;;  %v3172_v45 = vld [vmem:[#allocation7 + $0xc0] sm:$0xff] }
  0x20   :  { %709 = vmatpush.bf16.msra.mxu1 %v3088_v11  ;;  %v3160_v41 = vld [vmem:[#allocation7 + $0x48] sm:$0xff]  ;;  %v3174_v46 = vld [vmem:[#allocation7 + $0x138] sm:$0xff]  ;;  %v3178_v49 = vld [vmem:[#allocation7 + $0x40] sm:$0xff] }
  0x21   :  { %723 = vmatpush.bf16.msra.mxu2 %v3090_v12  ;;  %v3176_v47 = vld [vmem:[#allocation7 + $0x1f8] sm:$0xff]  ;;  %v3186_v55 = vld [vmem:[#allocation7 + $0x1b0] sm:$0xff]  ;;  %v3266_v22 = vld [vmem:[#allocation7 + $0x148] sm:$0xff] }
  0x22   :  { %697 = vmatpush.bf16.msra.mxu0 %v3094_v13  ;;  %v3180_v50 = vld [vmem:[#allocation7 + $0x178] sm:$0xff]  ;;  %v3190_v58 = vld [vmem:[#allocation7 + $0x130] sm:$0xff] }
  0x23   :  { %736 = vmatpush.bf16.msra.mxu3 %v3102_v16  ;;  %v283_v28 = vld.sshfl [vmem:[#allocation1] sm:$0xff pattern:$0x73625140]  ;;  %v3134_v29 = vld.sshfl [vmem:[#allocation1 + $0x8] sm:$0xff pattern:$0x73625140] }
  0x24   :  { %710 = vmatpush.bf16.msra.mxu1 %v3104_v17  ;;  %v285_v31 = vld.sshfl [vmem:[#allocation1 + $0x10] sm:$0xff pattern:$0x73625140]  ;;  %v286_v32 = vld.sshfl [vmem:[#allocation1 + $0x18] sm:$0xff pattern:$0x73625140]  ;;  %v299_v54 = vpack.c.bf16 %v283_v28, %v283_v28  ;;  %v300_v63 = vpack.c.bf16 %v3134_v29, %v3134_v29 }
  0x25   :  { %724 = vmatpush.bf16.msra.mxu2 %v3110_v18  ;;  %v3142_v34 = vld.sshfl [vmem:[#allocation1 + $0x20] sm:$0xff pattern:$0x73625140]  ;;  %v3144_v35 = vld.sshfl [vmem:[#allocation1 + $0x28] sm:$0xff pattern:$0x73625140]  ;;  %v301_v51 = vpack.c.bf16 %v285_v31, %v285_v31  ;;  %v302_v56 = vpack.c.bf16 %v286_v32, %v286_v32 }
  0x26   :  { %698 = vmatpush.bf16.msra.mxu0 %v3112_v19  ;;  %v3146_v36 = vld.sshfl [vmem:[#allocation1 + $0x30] sm:$0xff pattern:$0x73625140]  ;;  %v3148_v37 = vld.sshfl [vmem:[#allocation1 + $0x38] sm:$0xff pattern:$0x73625140] }
  0x27   :  { %737 = vmatpush.bf16.msra.mxu3 %v3116_v20  ;;  %836 = vst [vmem:[#allocation1] ss:$4 sm:$0xff] %v832_v30  ;;  %v3192_v59 = vld [vmem:[#allocation7 + $0x1f0] sm:$0xff]  ;;  %v3209_v29 = vld [vmem:[#allocation7 + $0x128] sm:$0xff]  ;;  %v3237_v14 = vld [vmem:[#allocation7 + $0x118] sm:$0xff] }
  0x28   :  { %711 = vmatpush.bf16.msra.mxu1 %v3118_v21  ;;  %838 = vst [vmem:[#allocation1 + $0x20] ss:$4 sm:$0xff] %v833_v33  ;;  %v3201_v31 = vld [vmem:[#allocation7 + $0x170] sm:$0xff]  ;;  %v3205_v33 = vld [vmem:[#allocation7 + $0x1a8] sm:$0xff]  ;;  %v3239_v24 = vld [vmem:[#allocation7 + $0x1d8] sm:$0xff] }
  0x29   :  { %725 = vmatpush.bf16.msra.mxu2 %v3122_v23  ;;  %4188 = vst [vmem:[#allocation19_spill] sm:$0xff] %v3239_v24 }
  0x2a   :  { %699 = vmatpush.bf16.msra.mxu0 %v3126_v25 }
  0x2b   :  { %738 = vmatpush.bf16.msra.mxu3 %v3128_v26 }
  0x2c   :  { %712 = vmatpush.bf16.msra.mxu1 %v3130_v27 }
  0x2d   :  { %726 = vmatpush.bf16.msra.mxu2 %v3152_v38 }
  0x2e   :  { %700 = vmatpush.bf16.msra.mxu0 %v3154_v39  ;;  %v839_v48 = vld.sshfl [vmem:[#allocation1] sm:$0xff pattern:$0x73625140]  ;;  %v840_v52 = vld.sshfl [vmem:[#allocation1 + $0x8] sm:$0xff pattern:$0x73625140] }
  0x2f   :  { %739 = vmatpush.bf16.msra.mxu3 %v3158_v40  ;;  %v841_v53 = vld.sshfl [vmem:[#allocation1 + $0x10] sm:$0xff pattern:$0x73625140]  ;;  %v842_v57 = vld.sshfl [vmem:[#allocation1 + $0x18] sm:$0xff pattern:$0x73625140] }
  0x30   :  { %713 = vmatpush.bf16.msra.mxu1 %v3160_v41  ;;  %v855_v60 = vsel %vm801_vm0, %v839_v48, 0.0  ;;  %v856_v61 = vsel %vm801_vm0, %v840_v52, 0.0  ;;  %v858_v62 = vsel %vm801_vm0, %v841_v53, 0.0  ;;  %v843_v28 = vld.sshfl [vmem:[#allocation1 + $0x20] sm:$0xff pattern:$0x73625140] }
  0x31   :  { %727 = vmatpush.bf16.msra.mxu2 %v3164_v42  ;;  %v857_v30 = vadd.f32 %v856_v61, %v855_v60  ;;  %v860_v32 = vsel %vm801_vm0, %v842_v57, 0.0  ;;  %v844_v48 = vld.sshfl [vmem:[#allocation1 + $0x28] sm:$0xff pattern:$0x73625140]  ;;  %v862_v53 = vsel %vm801_vm0, %v843_v28, 0.0  ;;  %v3215_v60 = vld [vmem:[#allocation7 + $0x168] sm:$0xff] }
  0x32   :  { %701 = vmatpush.bf16.msra.mxu0 %v3166_v43  ;;  %v3219_v61 = vld [vmem:[#allocation7 + $0x1a0] sm:$0xff] }
  0x33   :  { %740 = vmatpush.bf16.msra.mxu3 %v3172_v45  ;;  %v859_v52 = vadd.f32 %v858_v62, %v857_v30  ;;  %v846_v62 = vld.sshfl [vmem:[#allocation1 + $0x38] sm:$0xff pattern:$0x73625140]  ;;  %v3223_v28 = vld [vmem:[#allocation7 + $0x120] sm:$0xff] }
  0x34   :  { %714 = vmatpush.bf16.msra.mxu1 %v3178_v49  ;;  %728 = vmatmul.bf16.vlgmr.msra.gmra.mxu2 %v301_v51  ;;  %v3211_v51 = vld [vmem:[#allocation7 + $0x1e8] sm:$0xff]  ;;  %v868_v15 = vsel %vm801_vm0, %v846_v62, 0.0  ;;  %v3245_v62 = vld [vmem:[#allocation7 + $0x190] sm:$0xff] }
  0x35   :  { %772 = vmatpush.bf16.msrb.mxu2 %v3170_v44  ;;  %702 = vmatmul.bf16.vlgmr.msra.gmra.mxu0 %v299_v54  ;;  %v845_v54 = vld.sshfl [vmem:[#allocation1 + $0x30] sm:$0xff pattern:$0x73625140]  ;;  %v861_v57 = vadd.f32 %v860_v32, %v859_v52  ;;  %4189 = vst [vmem:[#allocation20_spill] sm:$0xff] %v3245_v62 }
  0x36   :  { %746 = vmatpush.bf16.msrb.mxu0 %v3174_v46  ;;  %741 = vmatmul.bf16.vlgmr.msra.gmra.mxu3 %v302_v56  ;;  %v864_v56 = vsel %vm801_vm0, %v844_v48, 0.0  ;;  %v866_v32 = vsel %vm801_vm0, %v845_v54, 0.0  ;;  %v3229_v48 = vld [vmem:[#allocation7 + $0x160] sm:$0xff] }
  0x37   :  { %785 = vmatpush.bf16.msrb.mxu3 %v3176_v47  ;;  %715 = vmatmul.bf16.vlgmr.msra.gmra.mxu1 %v300_v63  ;;  %v863_v30 = vadd.f32 %v862_v53, %v861_v57  ;;  %v3225_v63 = vld [vmem:[#allocation7 + $0x1e0] sm:$0xff]  ;;  %v3233_v53 = vld [vmem:[#allocation7 + $0x198] sm:$0xff] }
  0x38   :  { %759 = vmatpush.bf16.msrb.mxu1 %v3180_v50 }
  0x39   :  { %773 = vmatpush.bf16.msrb.mxu2 %v3186_v55  ;;  %v865_v52 = vadd.f32 %v864_v56, %v863_v30  ;;  %v3242_v56 = vld [vmem:[#allocation7 + $0x158] sm:$0xff]  ;;  %v3248_v30 = vld [vmem:[#allocation7 + $0x110] sm:$0xff] }
  0x3a   :  { %747 = vmatpush.bf16.msrb.mxu0 %v3190_v58  ;;  %4190 = vst [vmem:[#allocation21_spill] sm:$0xff] %v3248_v30 }
  0x3b   :  { %786 = vmatpush.bf16.msrb.mxu3 %v3192_v59  ;;  %v867_v57 = vadd.f32 %v866_v32, %v865_v52  ;;  %v3251_v32 = vld [vmem:[#allocation7 + $0x1d0] sm:$0xff]  ;;  %v3257_v52 = vld [vmem:[#allocation7 + $0x188] sm:$0xff] }
  0x3c   :  { %760 = vmatpush.bf16.msrb.mxu1 %v3201_v31  ;;  %4191 = vst [vmem:[#allocation22_spill] sm:$0xff] %v3251_v32 }
  0x3d   :  { %774 = vmatpush.bf16.msrb.mxu2 %v3205_v33  ;;  %v869_v54 = vadd.f32 %v868_v15, %v867_v57  ;;  %v3254_v15 = vld [vmem:[#allocation7 + $0x150] sm:$0xff]  ;;  %4193 = vst [vmem:[#allocation24_spill] sm:$0xff] %v3257_v52  ;;  %v3260_v57 = vld [vmem:[#allocation7 + $0x108] sm:$0xff] }
  0x3e   :  { %748 = vmatpush.bf16.msrb.mxu0 %v3209_v29  ;;  %4192 = vst [vmem:[#allocation23_spill] sm:$0xff] %v3254_v15 }
  0x3f   :  { %787 = vmatpush.bf16.msrb.mxu3 %v3211_v51  ;;  %870 = vadd.xlane.f32.xlu0 %v869_v54  ;;  %4194 = vst [vmem:[#allocation25_spill] sm:$0xff] %v3260_v57  ;;  %v3263_v54 = vld [vmem:[#allocation7 + $0x1c8] sm:$0xff] }
  0x40   :  { %761 = vmatpush.bf16.msrb.mxu1 %v3215_v60  ;;  %4195 = vst [vmem:[#allocation26_spill] sm:$0xff] %v3263_v54 }
  0x41   :  { %775 = vmatpush.bf16.msrb.mxu2 %v3219_v61 }
  0x42   :  { %749 = vmatpush.bf16.msrb.mxu0 %v3223_v28 }
  0x43   :  { %788 = vmatpush.bf16.msrb.mxu3 %v3225_v63 }
  0x44   :  { %762 = vmatpush.bf16.msrb.mxu1 %v3229_v48 }
  0x45   :  { %776 = vmatpush.bf16.msrb.mxu2 %v3233_v53 }
  0x46   :  { %750 = vmatpush.bf16.msrb.mxu0 %v3237_v14 }
  0x47   :  { %789 = vmatpush.bf16.msrb.mxu3 %v3239_v24  ;;  %v3269_v24 = vld [vmem:[#allocation7 + $0x180] sm:$0xff] }
  0x48   :  { %763 = vmatpush.bf16.msrb.mxu1 %v3242_v56 }
  0x49   :  { %777 = vmatpush.bf16.msrb.mxu2 %v3245_v62  ;;  %v3272_v62 = vld [vmem:[#allocation7 + $0x100] sm:$0xff] }
  0x4a   :  { %751 = vmatpush.bf16.msrb.mxu0 %v3248_v30  ;;  %v3275_v30 = vld [vmem:[#allocation7 + $0x1c0] sm:$0xff] }
  0x4b   :  { %790 = vmatpush.bf16.msrb.mxu3 %v3251_v32  ;;  %v305_v32 = vpack.c.bf16 %v3146_v36, %v3146_v36 }
  0x4c   :  { %764 = vmatpush.bf16.msrb.mxu1 %v3254_v15  ;;  %v3280_v15 = vld [vmem:[#allocation7 + $0x140] sm:$0xff] }
  0x4d   :  { %778 = vmatpush.bf16.msrb.mxu2 %v3257_v52  ;;  %v303_v52 = vpack.c.bf16 %v3142_v34, %v3142_v34 }
  0x4e   :  { %752 = vmatpush.bf16.msrb.mxu0 %v3260_v57  ;;  %v306_v57 = vpack.c.bf16 %v3148_v37, %v3148_v37 }
  0x4f   :  { %791 = vmatpush.bf16.msrb.mxu3 %v3263_v54  ;;  %v304_v54 = vpack.c.bf16 %v3144_v35, %v3144_v35 }
  0x50   :  { %765 = vmatpush.bf16.msrb.mxu1 %v3266_v22 }
  0x51   :  { %779 = vmatpush.bf16.msrb.mxu2 %v3269_v24 }
  0x52   :  { %753 = vmatpush.bf16.msrb.mxu0 %v3272_v62 }
  0x53   :  { %792 = vmatpush.bf16.msrb.mxu3 %v3275_v30 }
  0x54   :  { %780 = vmatmul.bf16.vlgmr.msrb.gmra.mxu2 %v305_v32  ;;  %766 = vmatpush.bf16.msrb.mxu1 %v3280_v15 }
  0x55   :  { %964 = vmatpush.bf16.msra.mxu2 %v3058_v0  ;;  %754 = vmatmul.bf16.vlgmr.msrb.gmra.mxu0 %v303_v52  ;;  %v4196_v0 = vld [vmem:[#allocation20_spill] sm:$0xff] }
  0x56   :  { %938 = vmatpush.bf16.msra.mxu0 %v3060_v1  ;;  %793 = vmatmul.bf16.vlgmr.msrb.gmra.mxu3 %v306_v57  ;;  %v4197_v1 = vld [vmem:[#allocation19_spill] sm:$0xff] }
  0x57   :  { %767 = vmatmul.bf16.vlgmr.msrb.gmra.mxu1 %v304_v54  ;;  %977 = vmatpush.bf16.msra.mxu3 %v3062_v2  ;;  %v4198_v2 = vld [vmem:[#allocation21_spill] sm:$0xff] }
  0x58   :  { %951 = vmatpush.bf16.msra.mxu1 %v3064_v3  ;;  %v4199_v3 = vld [vmem:[#allocation23_spill] sm:$0xff]  ;;  %v4205_v54 = vld [vmem:[#allocation17_spill] sm:$0xff] }
  0x59   :  { %965 = vmatpush.bf16.msra.mxu2 %v3068_v4  ;;  %v4200_v4 = vld [vmem:[#allocation24_spill] sm:$0xff] }
  0x5a   :  { %939 = vmatpush.bf16.msra.mxu0 %v3070_v5  ;;  %v4201_v5 = vld [vmem:[#allocation22_spill] sm:$0xff] }
  0x5b   :  { %978 = vmatpush.bf16.msra.mxu3 %v3074_v6  ;;  %v4202_v6 = vld [vmem:[#allocation25_spill] sm:$0xff] }
  0x5c   :  { %952 = vmatpush.bf16.msra.mxu1 %v3076_v7  ;;  %v4203_v7 = vld [vmem:[#allocation26_spill] sm:$0xff] }
  0x5d   :  { %966 = vmatpush.bf16.msra.mxu2 %v3080_v8 }
  0x5e   :  { %940 = vmatpush.bf16.msra.mxu0 %v3082_v9 }
  0x5f   :  { %979 = vmatpush.bf16.msra.mxu3 %v3086_v10 }
  0x60   :  { %953 = vmatpush.bf16.msra.mxu1 %v3088_v11 }
  0x61   :  { %967 = vmatpush.bf16.msra.mxu2 %v3090_v12 }
  0x62   :  { %941 = vmatpush.bf16.msra.mxu0 %v3094_v13 }
  0x63   :  { %980 = vmatpush.bf16.msra.mxu3 %v3102_v16  ;;  %v3359_v16 = vld [vmem:[%s4068_s4] ss:$0 sm:$0xff] }
  0x64   :  { %954 = vmatpush.bf16.msra.mxu1 %v3104_v17 }
  0x65   :  { %968 = vmatpush.bf16.msra.mxu2 %v3110_v18 }
  0x66   :  { %942 = vmatpush.bf16.msra.mxu0 %v3112_v19 }
  0x67   :  { %981 = vmatpush.bf16.msra.mxu3 %v3116_v20 }
  0x68   :  { %955 = vmatpush.bf16.msra.mxu1 %v3118_v21 }
  0x69   :  { %969 = vmatpush.bf16.msra.mxu2 %v3122_v23 }
  0x6a   :  { %943 = vmatpush.bf16.msra.mxu0 %v3126_v25 }
  0x6b   :  { %982 = vmatpush.bf16.msra.mxu3 %v3128_v26  ;;  %v3014_v26 = vmov 269488144  }
  0x6c   :  { %956 = vmatpush.bf16.msra.mxu1 %v3130_v27  ;;  %v887_v27 = vunpack.c.l.s4 %v3014_v26 }
  0x6d   :  { %970 = vmatpush.bf16.msra.mxu2 %v3152_v38 }
  0x6e   :  { %944 = vmatpush.bf16.msra.mxu0 %v3154_v39  ;;  %v888_v38 = vunpack.c.0.s8 %v887_v27 }
  0x6f   :  { %983 = vmatpush.bf16.msra.mxu3 %v3158_v40 }
  0x70   :  { %957 = vmatpush.bf16.msra.mxu1 %v3160_v41 }
  0x71   :  { %971 = vmatpush.bf16.msra.mxu2 %v3164_v42 }
  0x72   :  { %945 = vmatpush.bf16.msra.mxu0 %v3166_v43 }
  0x73   :  { %984 = vmatpush.bf16.msra.mxu3 %v3172_v45 }
  0x74   :  { %958 = vmatpush.bf16.msra.mxu1 %v3178_v49 }
  0x75   :  { %1016 = vmatpush.bf16.msrb.mxu2 %v3170_v44  ;;  %v275_v44 = vlaneseq }
  0x76   :  { %990 = vmatpush.bf16.msrb.mxu0 %v3174_v46 }
  0x77   :  { %1029 = vmatpush.bf16.msrb.mxu3 %v3176_v47  ;;  %v3362_v49 = vand.u32 127, %v275_v44 }
  0x78   :  { %1003 = vmatpush.bf16.msrb.mxu1 %v3180_v50 }
  0x79   :  { %1017 = vmatpush.bf16.msrb.mxu2 %v3186_v55  ;;  %4204 = vst [vmem:[#allocation20_spill] sm:$0xff] %v3362_v49  ;;  %vm277_vm3 = vcmp.lt.s32.totalorder %v3362_v49, 10  ;;  %v2468_v49 = vld [vmem:[#allocation8 + $0x90] sm:$0xf] }
  0x7a   :  { %991 = vmatpush.bf16.msrb.mxu0 %v3190_v58 }
  0x7b   :  { %1030 = vmatpush.bf16.msrb.mxu3 %v3192_v59 }
  0x7c   :  { %1004 = vmatpush.bf16.msrb.mxu1 %v3201_v31 }
  0x7d   :  { %1018 = vmatpush.bf16.msrb.mxu2 %v3205_v33 }
  0x7e   :  { %992 = vmatpush.bf16.msrb.mxu0 %v3209_v29 }
  0x7f   :  { %1031 = vmatpush.bf16.msrb.mxu3 %v3211_v51 }
  0x80   :  { %1005 = vmatpush.bf16.msrb.mxu1 %v3215_v60 }
  0x81   :  { %1019 = vmatpush.bf16.msrb.mxu2 %v3219_v61 }
  0x82   :  { %993 = vmatpush.bf16.msrb.mxu0 %v3223_v28 }
  0x83   :  { %1032 = vmatpush.bf16.msrb.mxu3 %v3225_v63 }
  0x84   :  { %1006 = vmatpush.bf16.msrb.mxu1 %v3229_v48 }
  0x85   :  { %1020 = vmatpush.bf16.msrb.mxu2 %v3233_v53 }
  0x86   :  { %994 = vmatpush.bf16.msrb.mxu0 %v3237_v14 }
  0x87   :  { %1033 = vmatpush.bf16.msrb.mxu3 %v4197_v1  ;;  %v4206_v1 = vld [vmem:[#allocation18_spill] sm:$0xff] }
  0x88   :  { %1007 = vmatpush.bf16.msrb.mxu1 %v3242_v56 }
  0x89   :  { %1021 = vmatpush.bf16.msrb.mxu2 %v4196_v0 }
  0x8a   :  { %995 = vmatpush.bf16.msrb.mxu0 %v4198_v2 }
  0x8b   :  { %1034 = vmatpush.bf16.msrb.mxu3 %v4201_v5  ;;  %v4208_v5 = vld [vmem:[#allocation16_spill] sm:$0xff] }
  0x8c   :  { %1008 = vmatpush.bf16.msrb.mxu1 %v4199_v3  ;;  %v4207_v3 = vld [vmem:[#allocation15_spill] sm:$0xff] }
  0x8d   :  { %1022 = vmatpush.bf16.msrb.mxu2 %v4200_v4 }
  0x8e   :  { %996 = vmatpush.bf16.msrb.mxu0 %v4202_v6 }
  0x8f   :  { %1035 = vmatpush.bf16.msrb.mxu3 %v4203_v7 }
  0x90   :  { %1009 = vmatpush.bf16.msrb.mxu1 %v3266_v22 }
  0x91   :  { %1023 = vmatpush.bf16.msrb.mxu2 %v3269_v24 }
  0x92   :  { %997 = vmatpush.bf16.msrb.mxu0 %v3272_v62 }
  0x93   :  { %1036 = vmatpush.bf16.msrb.mxu3 %v3275_v30 }
  0x94   :  { %1010 = vmatpush.bf16.msrb.mxu1 %v3280_v15 }
  0xb2   :  { %v703_v8 = vpop.f32.mrf.mxu0  ;;  %v871_v10 = vpop.xlane.xlu0 %870 }
  0xb3   :  { %2783 = vrsqrt.f32 %v871_v10  ;;  %v704_v21 = vadd.f32 %v3359_v16, %v703_v8  ;;  %vm879_vm1 = vcmp.eq.f32.partialorder %v871_v10, inf  ;;  %v882_v36 = vand.u32 2147483648, %v871_v10 }
  0xb4   :  { %v716_v9 = vpop.f32.mrf.mxu1  ;;  %vm881_vm2 = vcmp.eq.f32.partialorder %v871_v10, 0.0 }
  0xb5   :  { %v717_v25 = vadd.f32 %v716_v9, %v704_v21 }
  0xb7   :  { %v729_v11 = vpop.f32.mrf.mxu2 }
  0xb8   :  { %v730_v37 = vadd.f32 %v729_v11, %v717_v25 }
  0xb9   :  { %v742_v12 = vpop.f32.mrf.mxu3  ;;  %v2784_v14 = vpop.eup %2783 }
  0xba   :  { %v705_v13 = vpop.f32.mrf.mxu0  ;;  %v873_v18 = vmul.f32 %v2784_v14, %v871_v10  ;;  %v743_v42 = vadd.f32 %v742_v12, %v730_v37 }
  0xbc   :  { %v718_v17 = vpop.f32.mrf.mxu1  ;;  %v874_v20 = vmul.f32 %v2784_v14, %v873_v18 }
  0xbe   :  { %v875_v23 = vmul.f32 0.5, %v874_v20 }
  0xbf   :  { %v731_v19 = vpop.f32.mrf.mxu2 }
  0xc0   :  { %v876_v24 = vsub.f32 1.5, %v875_v23 }
  0xc1   :  { %v744_v22 = vpop.f32.mrf.mxu3 }
  0xc2   :  { %v877_v34 = vmul.f32 %v2784_v14, %v876_v24 }
  0xc4   :  { %v878_v35 = vmul.f32 %v877_v34, %v871_v10 }
  0xc6   :  { %v880_v39 = vsel %vm879_vm1, %v871_v10, %v878_v35 }
  0xc7   :  { %v883_v40 = vsel %vm881_vm2, %v882_v36, %v880_v39 }
  0xc8   :  { %v884_v41 = vadd.f32 1e-08, %v883_v40 }
  0xca   :  { %v889_v43 = vperm.slane %v884_v41, %v888_v38 }
  0xcc   :  { %2785 = vrcp.f32 %v889_v43  ;;  %v902_v63 = vand.u32 2147483648, %v889_v43  ;;  %v900_v56 = vand.u32 2147483647, %v889_v43  ;;  %vm896_vm5 = vweird.f32 %v889_v43 }
  0xce   :  { %v903_v32 = vor.u32 1.1754944e-38, %v902_v63  ;;  %vm901_vm7 = vcmp.eq.f32.partialorder %v900_v56, 8.507059e+37 }
  0xd2   :  { %v755_v45 = vpop.f32.mrf.mxu0  ;;  %v2786_v59 = vpop.eup %2785 }
  0xd3   :  { %v756_v46 = vadd.f32 %v755_v45, %v743_v42  ;;  %v892_v33 = vmul.f32 %v2786_v59, %v889_v43  ;;  %vm897_vm4 = vweird.f32 %v2786_v59 }
  0xd4   :  { %v768_v47 = vpop.f32.mrf.mxu1  ;;  %vm898_vm6 = vmor %vm896_vm5, %vm897_vm4 }
  0xd5   :  { %v769_v50 = vadd.f32 %v768_v47, %v756_v46  ;;  %v893_v60 = vsub.f32 1.0, %v892_v33 }
  0xd7   :  { %v781_v55 = vpop.f32.mrf.mxu2  ;;  %v894_v53 = vmul.f32 %v2786_v59, %v893_v60 }
  0xd8   :  { %v782_v58 = vadd.f32 %v781_v55, %v769_v50 }
  0xd9   :  { %v794_v31 = vpop.f32.mrf.mxu3  ;;  %v895_v30 = vadd.f32 %v2786_v59, %v894_v53 }
  0xda   :  { %v795_v29 = vadd.f32 %v794_v31, %v782_v58  ;;  %v757_v51 = vpop.f32.mrf.mxu0 }
  0xdb   :  { %v899_v52 = vsel %vm898_vm6, %v2786_v59, %v895_v30 }
  0xdc   :  { %v3367_v61 = vsel %vm277_vm3, %v795_v29, -inf  ;;  %v770_v28 = vpop.f32.mrf.mxu1  ;;  %v904_v57 = vsel %vm901_vm7, %v903_v32, %v899_v52 }
  0xdd   :  { %v802_v48 = vsel %vm801_vm0, %v3367_v61, -inf  ;;  %v905_v0 = vmul.f32 %v904_v57, %v4205_v54  ;;  %v906_v2 = vmul.f32 %v904_v57, %v4206_v1  ;;  %v2612_v1 = vld [vmem:[#allocation8 + $0x1c0] sm:$0xf] }
  0xde   :  { %803 = vmax.xlane.f32.xlu0 %v802_v48 }
  0xdf   :  { %v783_v62 = vpop.f32.mrf.mxu2  ;;  %v907_v4 = vadd.f32 %v905_v0, %v4207_v3  ;;  %v908_v6 = vadd.f32 %v906_v2, %v4208_v5  ;;  %v2766_v2 = vld [vmem:[#allocation8 + $0x1dc] sm:$0xf0] }
  0xe1   :  { %v796_v15 = vpop.f32.mrf.mxu3  ;;  %911 = vst [vmem:[#allocation1] ss:$4 sm:$0xff] %v907_v4  ;;  %v2762_v4 = vld [vmem:[#allocation8 + $0x1c4] sm:$0xf] }
  0xe2   :  { %913 = vst [vmem:[#allocation1 + $0x20] ss:$4 sm:$0xff] %v908_v6  ;;  %v3396_v6 = vor.u32 %v2766_v2, %v2612_v1  ;;  %v2486_v1 = vld [vmem:[#allocation8 + $0xe0] sm:$0xf0]  ;;  %v2492_v2 = vld [vmem:[#allocation8 + $0xc8] sm:$0xf] }
  0xe8   :  { %v914_v7 = vld.sshfl [vmem:[#allocation1] sm:$0xff pattern:$0x73625140]  ;;  %v915_v8 = vld.sshfl [vmem:[#allocation1 + $0x8] sm:$0xff pattern:$0x73625140] }
  0xe9   :  { %v930_v9 = vpack.c.bf16 %v914_v7, %v914_v7  ;;  %v931_v10 = vpack.c.bf16 %v915_v8, %v915_v8  ;;  %v916_v11 = vld.sshfl [vmem:[#allocation1 + $0x10] sm:$0xff pattern:$0x73625140]  ;;  %v917_v12 = vld.sshfl [vmem:[#allocation1 + $0x18] sm:$0xff pattern:$0x73625140] }
  0xea   :  { %v932_v13 = vpack.c.bf16 %v916_v11, %v916_v11  ;;  %v933_v14 = vpack.c.bf16 %v917_v12, %v917_v12  ;;  %v918_v17 = vld.sshfl [vmem:[#allocation1 + $0x20] sm:$0xff pattern:$0x73625140]  ;;  %v919_v18 = vld.sshfl [vmem:[#allocation1 + $0x28] sm:$0xff pattern:$0x73625140] }
  0xeb   :  { %946 = vmatmul.bf16.vlgmr.msra.gmra.mxu0 %v930_v9  ;;  %959 = vmatmul.bf16.vlgmr.msra.gmra.mxu1 %v931_v10  ;;  %v920_v19 = vld.sshfl [vmem:[#allocation1 + $0x30] sm:$0xff pattern:$0x73625140]  ;;  %v921_v20 = vld.sshfl [vmem:[#allocation1 + $0x38] sm:$0xff pattern:$0x73625140]  ;;  %v934_v21 = vpack.c.bf16 %v918_v17, %v918_v17  ;;  %v935_v22 = vpack.c.bf16 %v919_v18, %v919_v18 }
  0xec   :  { %972 = vmatmul.bf16.vlgmr.msra.gmra.mxu2 %v932_v13  ;;  %985 = vmatmul.bf16.vlgmr.msra.gmra.mxu3 %v933_v14  ;;  %v936_v23 = vpack.c.bf16 %v920_v19, %v920_v19  ;;  %v937_v24 = vpack.c.bf16 %v921_v20, %v921_v20  ;;  %v2614_v7 = vld [vmem:[#allocation8 + $0x1e0] sm:$0xf0]  ;;  %v2620_v8 = vld [vmem:[#allocation8 + $0x1c8] sm:$0xf]  ;;  %v2763_v12 = vld [vmem:[#allocation8 + $0x1cc] sm:$0xf] }
  0xed   :  { %v2767_v9 = vld [vmem:[#allocation8 + $0x1e4] sm:$0xf0]  ;;  %v3398_v10 = vor.u32 %v2762_v4, %v2614_v7  ;;  %v2622_v13 = vld [vmem:[#allocation8 + $0x1e8] sm:$0xf0]  ;;  %v2580_v14 = vld [vmem:[#allocation8 + $0x180] sm:$0xf]  ;;  %1394 = vmatpush.bf16.msra.mxu0 %v3396_v6 }
  0xee   :  { %v3400_v11 = vor.u32 %v2767_v9, %v2620_v8  ;;  %v3403_v17 = vor.u32 %v2763_v12, %v2622_v13  ;;  %v2758_v18 = vld [vmem:[#allocation8 + $0x19c] sm:$0xf0]  ;;  %v2754_v19 = vld [vmem:[#allocation8 + $0x184] sm:$0xf]  ;;  %v2735_v4 = vld [vmem:[#allocation8 + $0xe4] sm:$0xf0] }
  0xef   :  { %v2582_v20 = vld [vmem:[#allocation8 + $0x1a0] sm:$0xf0]  ;;  %1407 = vmatpush.bf16.msra.mxu1 %v3398_v10  ;;  %v2494_v7 = vld [vmem:[#allocation8 + $0xe8] sm:$0xf0] }
  0xf0   :  { %1420 = vmatpush.bf16.msra.mxu2 %v3400_v11  ;;  %1433 = vmatpush.bf16.msra.mxu3 %v3403_v17 }
  0xfb   :  { %998 = vmatmul.bf16.vlgmr.msrb.gmra.mxu0 %v934_v21  ;;  %1011 = vmatmul.bf16.vlgmr.msrb.gmra.mxu1 %v935_v22  ;;  %v3408_v22 = vor.u32 %v2758_v18, %v2580_v14  ;;  %v3464_v14 = vor.u32 %v2735_v4, %v2492_v2  ;;  %v2452_v18 = vld [vmem:[#allocation8 + $0x80] sm:$0xf] }
  0xfc   :  { %1024 = vmatmul.bf16.vlgmr.msrb.gmra.mxu2 %v936_v23  ;;  %1037 = vmatmul.bf16.vlgmr.msrb.gmra.mxu3 %v937_v24  ;;  %v3410_v23 = vor.u32 %v2754_v19, %v2582_v20  ;;  %v2588_v24 = vld [vmem:[#allocation8 + $0x188] sm:$0xf]  ;;  %v2726_v19 = vld [vmem:[#allocation8 + $0x9c] sm:$0xf0]  ;;  %v2722_v20 = vld [vmem:[#allocation8 + $0x84] sm:$0xf] }
  0xfd   :  { %1395 = vmatpush.bf16.msra.mxu0 %v3408_v22  ;;  %v2710_v4 = vld [vmem:[#allocation8 + $0x1c] sm:$0xf0] }
  0xfe   :  { %1408 = vmatpush.bf16.msra.mxu1 %v3410_v23 }
 0x151   :  { %v804_v45 = vpop.xlane.xlu0 %803 }
 0x152   :  { %v805_v47 = vsub.f32 %v3367_v61, %v804_v45 }
 0x154   :  { %v806_v59 = vmul.f32 1.442695, %v805_v47 }
 0x156   :  { %2787 = vpow2.f32 %v806_v59 }
 0x15c   :  { %v3380_v48 = vpop.eup %2787 }
 0x15d   :  { %v808_v61 = vsel %vm801_vm0, %v3380_v48, 0.0 }
 0x168   :  { %v947_v25 = vpop.f32.mrf.mxu0  ;;  %v960_v26 = vpop.f32.mrf.mxu1 }
 0x169   :  { %v948_v27 = vadd.f32 %v3359_v16, %v947_v25  ;;  %v2759_v25 = vld [vmem:[#allocation8 + $0x1a4] sm:$0xf0] }
 0x16b   :  { %v961_v38 = vadd.f32 %v960_v26, %v948_v27  ;;  %v2755_v26 = vld [vmem:[#allocation8 + $0x18c] sm:$0xf]  ;;  %v3413_v27 = vor.u32 %v2759_v25, %v2588_v24  ;;  %v2454_v25 = vld [vmem:[#allocation8 + $0xa0] sm:$0xf0] }
 0x16d   :  { %1421 = vmatpush.bf16.msra.mxu2 %v3413_v27 }
 0x16f   :  { %v973_v34 = vpop.f32.mrf.mxu2  ;;  %v986_v35 = vpop.f32.mrf.mxu3 }
 0x170   :  { %v949_v36 = vpop.f32.mrf.mxu0  ;;  %v962_v37 = vpop.f32.mrf.mxu1  ;;  %v974_v39 = vadd.f32 %v973_v34, %v961_v38  ;;  %v2590_v34 = vld [vmem:[#allocation8 + $0x1a8] sm:$0xf0]  ;;  %v2746_v38 = vld [vmem:[#allocation8 + $0x144] sm:$0xf] }
 0x171   :  { %v2750_v36 = vld [vmem:[#allocation8 + $0x15c] sm:$0xf0]  ;;  %v3415_v37 = vor.u32 %v2755_v26, %v2590_v34  ;;  %v2460_v26 = vld [vmem:[#allocation8 + $0x88] sm:$0xf] }
 0x172   :  { %v987_v42 = vadd.f32 %v986_v35, %v974_v39  ;;  %v2548_v35 = vld [vmem:[#allocation8 + $0x140] sm:$0xf]  ;;  %v2550_v39 = vld [vmem:[#allocation8 + $0x160] sm:$0xf0]  ;;  %v2727_v34 = vld [vmem:[#allocation8 + $0xa4] sm:$0xf0] }
 0x173   :  { %1434 = vmatpush.bf16.msra.mxu3 %v3415_v37 }
 0x177   :  { %v975_v40 = vpop.f32.mrf.mxu2  ;;  %v988_v41 = vpop.f32.mrf.mxu3 }
 0x178   :  { %v999_v43 = vpop.f32.mrf.mxu0  ;;  %v1012_v44 = vpop.f32.mrf.mxu1  ;;  %v2556_v40 = vld [vmem:[#allocation8 + $0x148] sm:$0xf]  ;;  %v3418_v41 = vor.u32 %v2750_v36, %v2548_v35  ;;  %v2723_v36 = vld [vmem:[#allocation8 + $0x8c] sm:$0xf] }
 0x179   :  { %v1000_v46 = vadd.f32 %v999_v43, %v987_v42  ;;  %v2751_v42 = vld [vmem:[#allocation8 + $0x164] sm:$0xf0]  ;;  %v2747_v43 = vld [vmem:[#allocation8 + $0x14c] sm:$0xf] }
 0x17a   :  { %v3426_v47 = vor.u32 %v2751_v42, %v2556_v40  ;;  %1396 = vmatpush.bf16.msra.mxu0 %v3418_v41 }
 0x17b   :  { %v1013_v50 = vadd.f32 %v1012_v44, %v1000_v46  ;;  %v2558_v44 = vld [vmem:[#allocation8 + $0x168] sm:$0xf0]  ;;  %v3424_v46 = vor.u32 %v2746_v38, %v2550_v39 }
 0x17c   :  { %1422 = vmatpush.bf16.msra.mxu2 %v3426_v47  ;;  %v2462_v38 = vld [vmem:[#allocation8 + $0xa8] sm:$0xf0] }
 0x17d   :  { %1409 = vmatpush.bf16.msra.mxu1 %v3424_v46 }
 0x17f   :  { %v1025_v55 = vpop.f32.mrf.mxu2  ;;  %v1038_v58 = vpop.f32.mrf.mxu3 }
 0x180   :  { %v1026_v16 = vadd.f32 %v1025_v55, %v1013_v50  ;;  %v1001_v31 = vpop.f32.mrf.mxu0  ;;  %v1014_v33 = vpop.f32.mrf.mxu1  ;;  %v2516_v50 = vld [vmem:[#allocation8 + $0x100] sm:$0xf] }
 0x181   :  { %v2742_v55 = vld [vmem:[#allocation8 + $0x11c] sm:$0xf0]  ;;  %v2518_v31 = vld [vmem:[#allocation8 + $0x120] sm:$0xf0]  ;;  %v2524_v33 = vld [vmem:[#allocation8 + $0x108] sm:$0xf] }
 0x182   :  { %v1039_v29 = vadd.f32 %v1038_v58, %v1026_v16  ;;  %v2738_v58 = vld [vmem:[#allocation8 + $0x104] sm:$0xf]  ;;  %v3431_v16 = vor.u32 %v2747_v43, %v2558_v44  ;;  %v3476_v43 = vor.u32 %v2726_v19, %v2452_v18  ;;  %v3480_v44 = vor.u32 %v2722_v20, %v2454_v25  ;;  %v2396_v19 = vld [vmem:[#allocation8 + $0x8] sm:$0xf] }
 0x183   :  { %v2711_v20 = vld [vmem:[#allocation8 + $0x24] sm:$0xf0] }
 0x184   :  { %v1042_v51 = vsel %vm277_vm3, %v1039_v29, -inf  ;;  %v2743_v29 = vld [vmem:[#allocation8 + $0x124] sm:$0xf0]  ;;  %1435 = vmatpush.bf16.msra.mxu3 %v3431_v16 }
 0x185   :  { %v1043_v60 = vsel %vm801_vm0, %v1042_v51, -inf }
 0x186   :  { %1044 = vmax.xlane.f32.xlu1 %v1043_v60  ;;  %v2739_v60 = vld [vmem:[#allocation8 + $0x10c] sm:$0xf] }
 0x187   :  { %v1027_v28 = vpop.f32.mrf.mxu2  ;;  %v1040_v63 = vpop.f32.mrf.mxu3 }
 0x188   :  { %v2715_v28 = vld [vmem:[#allocation8 + $0x4c] sm:$0xf] }
 0x18e   :  { %809 = vadd.xlane.f32.xlu1 %v808_v61  ;;  %v3443_v61 = vor.u32 %v2742_v55, %v2516_v50  ;;  %v2718_v50 = vld [vmem:[#allocation8 + $0x5c] sm:$0xf0]  ;;  %v2714_v55 = vld [vmem:[#allocation8 + $0x44] sm:$0xf] }
 0x190   :  { %1397 = vmatpush.bf16.msra.mxu0 %v3443_v61 }
 0x1f9   :  { %v1045_v53 = vpop.xlane.xlu1 %1044 }
 0x1fa   :  { %v1046_v56 = vsub.f32 %v1042_v51, %v1045_v53  ;;  %v2526_v53 = vld [vmem:[#allocation8 + $0x128] sm:$0xf0] }
 0x1fc   :  { %v1047_v62 = vmul.f32 1.442695, %v1046_v56 }
 0x1fe   :  { %2789 = vpow2.f32 %v1047_v62  ;;  %v3450_v62 = vor.u32 %v2738_v58, %v2518_v31  ;;  %v3485_v31 = vor.u32 %v2723_v36, %v2462_v38  ;;  %v2768_v36 = vld [vmem:[#allocation8 + $0x1ec] sm:$0xf0] }
 0x200   :  { %1410 = vmatpush.bf16.msra.mxu1 %v3450_v62 }
 0x201   :  { %v3388_v15 = vpop.xlane.xlu1 %809 }
 0x202   :  { %2791 = vrcp.f32 %v3388_v15  ;;  %v822_v0 = vand.u32 2147483648, %v3388_v15  ;;  %vm816_vm9 = vweird.f32 %v3388_v15  ;;  %v820_v51 = vand.u32 2147483647, %v3388_v15 }
 0x204   :  { %v3384_v30 = vpop.eup %2789  ;;  %v823_v63 = vor.u32 1.1754944e-38, %v822_v0  ;;  %v3455_v0 = vor.u32 %v2739_v60, %v2526_v53  ;;  %vm821_vm11 = vcmp.eq.f32.partialorder %v820_v51, 8.507059e+37  ;;  %v2719_v51 = vld [vmem:[#allocation8 + $0x64] sm:$0xf0]  ;;  %v2760_v53 = vld [vmem:[#allocation8 + $0x1ac] sm:$0xf0] }
 0x205   :  { %v1049_v32 = vsel %vm801_vm0, %v3384_v30, 0.0 }
 0x206   :  { %1050 = vadd.xlane.f32.xlu2 %v1049_v32  ;;  %v3452_v32 = vor.u32 %v2743_v29, %v2524_v33  ;;  %1436 = vmatpush.bf16.msra.mxu3 %v3455_v0  ;;  %v2422_v33 = vld [vmem:[#allocation8 + $0x60] sm:$0xf0]  ;;  %v2428_v29 = vld [vmem:[#allocation8 + $0x48] sm:$0xf] }
 0x207   :  { %v3507_v2 = vor.u32 %v2719_v51, %v2428_v29 }
 0x208   :  { %v3391_v52 = vpop.eup %2791  ;;  %1423 = vmatpush.bf16.msra.mxu2 %v3452_v32 }
 0x209   :  { %v812_v57 = vmul.f32 %v3391_v52, %v3388_v15  ;;  %vm817_vm8 = vweird.f32 %v3391_v52  ;;  %v2484_v15 = vld [vmem:[#allocation8 + $0xc0] sm:$0xf] }
 0x20a   :  { %vm3438_vm10 = vmor %vm816_vm9, %vm817_vm8  ;;  %vm1573_vm8 = vcmask 1045508   ;;  %vm1575_vm9 = vcmask 1043456  }
 0x20b   :  { %v813_v54 = vsub.f32 1.0, %v812_v57  ;;  %v2734_v57 = vld [vmem:[#allocation8 + $0xdc] sm:$0xf0] }
 0x20c   :  { %v3458_v9 = vor.u32 %v2734_v57, %v2484_v15  ;;  %1424 = vmatpush.bf16.msra.mxu2 %v3464_v14 }
 0x20d   :  { %v814_v21 = vmul.f32 %v3391_v52, %v813_v54  ;;  %v2730_v54 = vld [vmem:[#allocation8 + $0xc4] sm:$0xf] }
 0x20e   :  { %v3462_v13 = vor.u32 %v2730_v54, %v2486_v1  ;;  %1398 = vmatpush.bf16.msra.mxu0 %v3458_v9  ;;  %v3505_v1 = vor.u32 %v2714_v55, %v2422_v33  ;;  %v2765_v55 = vld [vmem:[#allocation8 + $0x1dc] sm:$0xf]  ;;  %v3529_v33 = vor.u32 %v2711_v20, %v2396_v19 }
 0x20f   :  { %v815_v45 = vadd.f32 %v3391_v52, %v814_v21  ;;  %v2606_v19 = vld [vmem:[#allocation8 + $0x1b8] sm:$0xf0] }
 0x210   :  { %1411 = vmatpush.bf16.msra.mxu1 %v3462_v13 }
 0x211   :  { %v819_v56 = vsel %vm3438_vm10, %v3391_v52, %v815_v45  ;;  %v2731_v52 = vld [vmem:[#allocation8 + $0xcc] sm:$0xf]  ;;  %v2420_v45 = vld [vmem:[#allocation8 + $0x40] sm:$0xf] }
 0x212   :  { %v824_v8 = vsel %vm821_vm11, %v823_v63, %v819_v56  ;;  %v3468_v24 = vor.u32 %v2731_v52, %v2494_v7  ;;  %v2430_v63 = vld [vmem:[#allocation8 + $0x68] sm:$0xf0]  ;;  %1399 = vmatpush.bf16.msra.mxu0 %v3476_v43  ;;  %v3501_v54 = vor.u32 %v2718_v50, %v2420_v45  ;;  %v2706_v52 = vld [vmem:[#allocation8 + $0x4] sm:$0xf]  ;;  %v2769_v50 = vld [vmem:[#allocation8 + $0x1f4] sm:$0xf0] }
 0x213   :  { %v3471_v35 = vmul.f32 %v3380_v48, %v824_v8  ;;  %v3482_v48 = vor.u32 %v2727_v34, %v2460_v26  ;;  %v2390_v7 = vld [vmem:[#allocation8 + $0x20] sm:$0xf0]  ;;  %v3512_v18 = vor.u32 %v2715_v28, %v2430_v63  ;;  %v2398_v26 = vld [vmem:[#allocation8 + $0x28] sm:$0xf0]  ;;  %v2628_v34 = vld [vmem:[#allocation8 + $0x1d0] sm:$0xf] }
 0x214   :  { %1437 = vmatpush.bf16.msra.mxu3 %v3468_v24  ;;  %1412 = vmatpush.bf16.msra.mxu1 %v3480_v44  ;;  %v3524_v45 = vor.u32 %v2706_v52, %v2390_v7  ;;  %v3533_v51 = vor.u32 %v2768_v36, %v2628_v34  ;;  %v2596_v63 = vld [vmem:[#allocation8 + $0x190] sm:$0xf]  ;;  %v2604_v52 = vld [vmem:[#allocation8 + $0x198] sm:$0xf] }
 0x215   :  { %4211 = vst [vmem:[#allocation19_spill] sm:$0xff] %v3471_v35  ;;  %v3489_v60 = vmul.f32 -0.05, %v3471_v35  ;;  %1425 = vmatpush.bf16.msra.mxu2 %v3482_v48  ;;  %v2761_v7 = vld [vmem:[#allocation8 + $0x1b4] sm:$0xf0]  ;;  %v3548_v20 = vor.u32 %v2760_v53, %v2596_v63 }
 0x216   :  { %1400 = vmatpush.bf16.msra.mxu0 %v3501_v54  ;;  %v3554_v34 = vor.u32 %v2761_v7, %v2604_v52  ;;  %v2740_v52 = vld [vmem:[#allocation8 + $0x114] sm:$0xf] }
 0x217   :  { %4212 = vst [vmem:[#allocation21_spill] sm:$0xff] %v3489_v60 }
 0x218   :  { %1438 = vmatpush.bf16.msra.mxu3 %v3485_v31  ;;  %1413 = vmatpush.bf16.msra.mxu1 %v3505_v1  ;;  %4219 = vst [vmem:[#allocation22_spill] sm:$0xff] %v3548_v20 }
 0x219   :  { %1426 = vmatpush.bf16.msra.mxu2 %v3507_v2  ;;  %4221 = vst [vmem:[#allocation26_spill] sm:$0xff] %v3554_v34 }
 0x21c   :  { %1439 = vmatpush.bf16.msra.mxu3 %v3512_v18  ;;  %1414 = vmatpush.bf16.msra.mxu1 %v3524_v45 }
 0x21d   :  { %1427 = vmatpush.bf16.msra.mxu2 %v3529_v33 }
 0x279   :  { %v3428_v59 = vpop.xlane.xlu2 %1050 }
 0x27a   :  { %2793 = vrcp.f32 %v3428_v59  ;;  %v1063_v40 = vand.u32 2147483648, %v3428_v59  ;;  %v1061_v42 = vand.u32 2147483647, %v3428_v59  ;;  %vm1057_vm13 = vweird.f32 %v3428_v59 }
 0x27c   :  { %v1064_v56 = vor.u32 1.1754944e-38, %v1063_v40  ;;  %vm3496_vm15 = vcmp.eq.f32.partialorder %v1061_v42, 8.507059e+37  ;;  %v2630_v40 = vld [vmem:[#allocation8 + $0x1f0] sm:$0xf0]  ;;  %v2636_v42 = vld [vmem:[#allocation8 + $0x1d8] sm:$0xf] }
 0x27d   :  { %v3539_v57 = vor.u32 %v2769_v50, %v2636_v42  ;;  %v2572_v42 = vld [vmem:[#allocation8 + $0x158] sm:$0xf] }
 0x27e   :  { %v2753_v50 = vld [vmem:[#allocation8 + $0x174] sm:$0xf0] }
 0x27f   :  { %4217 = vst [vmem:[#allocation23_spill] sm:$0xff] %v3539_v57  ;;  %1472 = vmatpush.bf16.msrb.mxu2 %v3539_v57  ;;  %v3566_v53 = vor.u32 %v2753_v50, %v2572_v42  ;;  %v2542_v42 = vld [vmem:[#allocation8 + $0x138] sm:$0xf0] }
 0x280   :  { %v2794_v12 = vpop.eup %2793 }
 0x281   :  { %v1053_v21 = vmul.f32 %v2794_v12, %v3428_v59  ;;  %vm1058_vm12 = vweird.f32 %v2794_v12  ;;  %v2388_v59 = vld [vmem:[#allocation8] sm:$0xf]  ;;  %4225 = vst [vmem:[#allocation16_spill] sm:$0xff] %v3566_v53 }
 0x282   :  { %vm3492_vm14 = vmor %vm1057_vm13, %vm1058_vm12 }
 0x283   :  { %v1054_v39 = vsub.f32 1.0, %v1053_v21  ;;  %v2707_v21 = vld [vmem:[#allocation8 + $0xc] sm:$0xf]  ;;  %1473 = vmatpush.bf16.msrb.mxu2 %v3554_v34 }
 0x284   :  { %v3531_v29 = vor.u32 %v2707_v21, %v2398_v26  ;;  %v2752_v26 = vld [vmem:[#allocation8 + $0x16c] sm:$0xf0] }
 0x285   :  { %v1055_v58 = vmul.f32 %v2794_v12, %v1054_v39  ;;  %v3520_v39 = vor.u32 %v2710_v4, %v2388_v59  ;;  %v2598_v4 = vld [vmem:[#allocation8 + $0x1b0] sm:$0xf0] }
 0x286   :  { %1440 = vmatpush.bf16.msra.mxu3 %v3531_v29 }
 0x287   :  { %v1056_v15 = vadd.f32 %v2794_v12, %v1055_v58  ;;  %v2638_v58 = vld [vmem:[#allocation8 + $0x1f8] sm:$0xf0]  ;;  %1401 = vmatpush.bf16.msra.mxu0 %v3520_v39  ;;  %1474 = vmatpush.bf16.msrb.mxu2 %v3566_v53  ;;  %v2716_v53 = vld [vmem:[#allocation8 + $0x54] sm:$0xf] }
 0x288   :  { %v3541_v59 = vor.u32 %v2765_v55, %v2638_v58  ;;  %v2749_v55 = vld [vmem:[#allocation8 + $0x15c] sm:$0xf] }
 0x289   :  { %v1060_v8 = vsel %vm3492_vm14, %v2794_v12, %v1056_v15  ;;  %v2764_v12 = vld [vmem:[#allocation8 + $0x1d4] sm:$0xf]  ;;  %v2574_v58 = vld [vmem:[#allocation8 + $0x178] sm:$0xf0] }
 0x28a   :  { %v1065_v25 = vsel %vm3496_vm15, %v1064_v56, %v1060_v8  ;;  %v3535_v28 = vor.u32 %v2764_v12, %v2630_v40  ;;  %v2756_v56 = vld [vmem:[#allocation8 + $0x194] sm:$0xf]  ;;  %4218 = vst [vmem:[#allocation24_spill] sm:$0xff] %v3541_v59  ;;  %v2757_v8 = vld [vmem:[#allocation8 + $0x19c] sm:$0xf]  ;;  %1485 = vmatpush.bf16.msrb.mxu3 %v3541_v59 }
 0x28b   :  { %v3517_v38 = vmul.f32 %v3384_v30, %v1065_v25  ;;  %1446 = vmatpush.bf16.msrb.mxu0 %v3533_v51  ;;  %v3550_v21 = vor.u32 %v2756_v56, %v2598_v4  ;;  %v2564_v25 = vld [vmem:[#allocation8 + $0x150] sm:$0xf]  ;;  %v3556_v36 = vor.u32 %v2757_v8, %v2606_v19  ;;  %v2748_v12 = vld [vmem:[#allocation8 + $0x154] sm:$0xf]  ;;  %v3568_v56 = vor.u32 %v2749_v55, %v2574_v58  ;;  %v2540_v19 = vld [vmem:[#allocation8 + $0x118] sm:$0xf] }
 0x28c   :  { %1459 = vmatpush.bf16.msrb.mxu1 %v3535_v28  ;;  %v2566_v40 = vld [vmem:[#allocation8 + $0x170] sm:$0xf0]  ;;  %v2744_v4 = vld [vmem:[#allocation8 + $0x12c] sm:$0xf0] }
 0x28d   :  { %v1067_v30 = vmul.f32 %v3517_v38, %v3489_v60  ;;  %4220 = vst [vmem:[#allocation25_spill] sm:$0xff] %v3550_v21  ;;  %v3562_v63 = vor.u32 %v2748_v12, %v2566_v40  ;;  %v2534_v8 = vld [vmem:[#allocation8 + $0x130] sm:$0xf0]  ;;  %v2741_v40 = vld [vmem:[#allocation8 + $0x11c] sm:$0xf] }
 0x28e   :  { %4222 = vst [vmem:[#allocation17_spill] sm:$0xff] %v3556_v36  ;;  %1486 = vmatpush.bf16.msrb.mxu3 %v3556_v36  ;;  %v3581_v50 = vor.u32 %v2741_v40, %v2542_v42  ;;  %v2500_v55 = vld [vmem:[#allocation8 + $0xd0] sm:$0xf]  ;;  %v2733_v40 = vld [vmem:[#allocation8 + $0xdc] sm:$0xf] }
 0x28f   :  { %v1068_v15 = vsel %vm801_vm0, %v1067_v30, 0.0  ;;  %1447 = vmatpush.bf16.msrb.mxu0 %v3548_v20  ;;  %v3560_v30 = vor.u32 %v2752_v26, %v2564_v25  ;;  %4224 = vst [vmem:[#allocation15_spill] sm:$0xff] %v3562_v63  ;;  %v2745_v25 = vld [vmem:[#allocation8 + $0x134] sm:$0xf0]  ;;  %v3576_v26 = vor.u32 %v2740_v52, %v2534_v8  ;;  %v2736_v58 = vld [vmem:[#allocation8 + $0xec] sm:$0xf0] }
 0x290   :  { %1069 = vadd.xlane.f32.xlu2 %v1068_v15  ;;  %1460 = vmatpush.bf16.msrb.mxu1 %v3550_v21  ;;  %4226 = vst [vmem:[#allocation27_spill] sm:$0xff] %v3568_v56  ;;  %v2532_v15 = vld [vmem:[#allocation8 + $0x110] sm:$0xf]  ;;  %v3578_v12 = vor.u32 %v2745_v25, %v2540_v19  ;;  %v2502_v52 = vld [vmem:[#allocation8 + $0xf0] sm:$0xf0] }
 0x291   :  { %4223 = vst [vmem:[#allocation18_spill] sm:$0xff] %v3560_v30  ;;  %v3574_v7 = vor.u32 %v2744_v4, %v2532_v15  ;;  %v2732_v15 = vld [vmem:[#allocation8 + $0xd4] sm:$0xf]  ;;  %v3586_v4 = vor.u32 %v2736_v58, %v2500_v55  ;;  %v2508_v8 = vld [vmem:[#allocation8 + $0xd8] sm:$0xf] }
 0x292   :  { %1487 = vmatpush.bf16.msrb.mxu3 %v3568_v56  ;;  %4228 = vst [vmem:[#allocation29_spill] sm:$0xff] %v3576_v26  ;;  %1475 = vmatpush.bf16.msrb.mxu2 %v3578_v12  ;;  %v2737_v19 = vld [vmem:[#allocation8 + $0xf4] sm:$0xf0]  ;;  %v3588_v25 = vor.u32 %v2732_v15, %v2502_v52  ;;  %v2510_v42 = vld [vmem:[#allocation8 + $0xf8] sm:$0xf0] }
 0x293   :  { %1448 = vmatpush.bf16.msrb.mxu0 %v3560_v30  ;;  %4227 = vst [vmem:[#allocation28_spill] sm:$0xff] %v3574_v7  ;;  %v3590_v35 = vor.u32 %v2737_v19, %v2508_v8  ;;  %v2470_v56 = vld [vmem:[#allocation8 + $0xb0] sm:$0xf0]  ;;  %v2476_v15 = vld [vmem:[#allocation8 + $0x98] sm:$0xf] }
 0x294   :  { %1461 = vmatpush.bf16.msrb.mxu1 %v3562_v63  ;;  %4229 = vst [vmem:[#allocation30_spill] sm:$0xff] %v3578_v12  ;;  %v3593_v12 = vor.u32 %v2733_v40, %v2510_v42  ;;  %v2729_v52 = vld [vmem:[#allocation8 + $0xb4] sm:$0xf0]  ;;  %v2725_v8 = vld [vmem:[#allocation8 + $0x9c] sm:$0xf] }
 0x295   :  { %4230 = vst [vmem:[#allocation31_spill] sm:$0xff] %v3581_v50  ;;  %v3602_v19 = vor.u32 %v2729_v52, %v2476_v15  ;;  %v2478_v40 = vld [vmem:[#allocation8 + $0xb8] sm:$0xf0]  ;;  %v2436_v42 = vld [vmem:[#allocation8 + $0x50] sm:$0xf] }
 0x296   :  { %1488 = vmatpush.bf16.msrb.mxu3 %v3581_v50  ;;  %4231 = vst [vmem:[#allocation32_spill] sm:$0xff] %v3586_v4  ;;  %1476 = vmatpush.bf16.msrb.mxu2 %v3590_v35  ;;  %v3604_v50 = vor.u32 %v2725_v8, %v2478_v40  ;;  %v2444_v63 = vld [vmem:[#allocation8 + $0x58] sm:$0xf]  ;;  %v2404_v8 = vld [vmem:[#allocation8 + $0x10] sm:$0xf] }
 0x297   :  { %1449 = vmatpush.bf16.msrb.mxu0 %v3574_v7  ;;  %4232 = vst [vmem:[#allocation33_spill] sm:$0xff] %v3588_v25  ;;  %v2724_v7 = vld [vmem:[#allocation8 + $0x94] sm:$0xf]  ;;  %v2712_v40 = vld [vmem:[#allocation8 + $0x2c] sm:$0xf0] }
 0x298   :  { %1462 = vmatpush.bf16.msrb.mxu1 %v3576_v26  ;;  %4233 = vst [vmem:[#allocation34_spill] sm:$0xff] %v3590_v35  ;;  %v2728_v26 = vld [vmem:[#allocation8 + $0xac] sm:$0xf0]  ;;  %v3599_v58 = vor.u32 %v2724_v7, %v2470_v56  ;;  %v2721_v56 = vld [vmem:[#allocation8 + $0x74] sm:$0xf0] }
 0x299   :  { %4234 = vst [vmem:[#allocation35_spill] sm:$0xff] %v3593_v12  ;;  %v3597_v55 = vor.u32 %v2728_v26, %v2468_v49  ;;  %v2717_v7 = vld [vmem:[#allocation8 + $0x5c] sm:$0xf]  ;;  %v3613_v52 = vor.u32 %v2721_v56, %v2444_v63 }
 0x29a   :  { %4236 = vst [vmem:[#allocation37_spill] sm:$0xff] %v3599_v58  ;;  %1489 = vmatpush.bf16.msrb.mxu3 %v3593_v12  ;;  %v2446_v26 = vld [vmem:[#allocation8 + $0x78] sm:$0xf0]  ;;  %1477 = vmatpush.bf16.msrb.mxu2 %v3602_v19  ;;  %v2708_v12 = vld [vmem:[#allocation8 + $0x14] sm:$0xf] }
 0x29b   :  { %1450 = vmatpush.bf16.msrb.mxu0 %v3586_v4  ;;  %4235 = vst [vmem:[#allocation36_spill] sm:$0xff] %v3597_v55  ;;  %v2720_v4 = vld [vmem:[#allocation8 + $0x6c] sm:$0xf0]  ;;  %v3616_v35 = vor.u32 %v2717_v7, %v2446_v26  ;;  %v2709_v30 = vld [vmem:[#allocation8 + $0x1c] sm:$0xf] }
 0x29c   :  { %1463 = vmatpush.bf16.msrb.mxu1 %v3588_v25  ;;  %4237 = vst [vmem:[#allocation38_spill] sm:$0xff] %v3602_v19  ;;  %v2438_v25 = vld [vmem:[#allocation8 + $0x70] sm:$0xf0]  ;;  %v3607_v49 = vor.u32 %v2720_v4, %v2436_v42  ;;  %v2412_v42 = vld [vmem:[#allocation8 + $0x18] sm:$0xf] }
 0x29d   :  { %4238 = vst [vmem:[#allocation39_spill] sm:$0xff] %v3604_v50  ;;  %v3611_v15 = vor.u32 %v2716_v53, %v2438_v25  ;;  %v2406_v4 = vld [vmem:[#allocation8 + $0x30] sm:$0xf0]  ;;  %v2414_v36 = vld [vmem:[#allocation8 + $0x38] sm:$0xf0] }
 0x29e   :  { %4239 = vst [vmem:[#allocation40_spill] sm:$0xff] %v3607_v49  ;;  %1490 = vmatpush.bf16.msrb.mxu3 %v3604_v50  ;;  %1478 = vmatpush.bf16.msrb.mxu2 %v3613_v52  ;;  %v3623_v63 = vor.u32 %v2708_v12, %v2406_v4  ;;  %v3628_v25 = vor.u32 %v2709_v30, %v2414_v36  ;;  %v3636_v36 = vld [vmem:[#allocation7 + $0x38] sm:$0xff]  ;;  %v3654_v4 = vld [vmem:[#allocation7 + $0xb0] sm:$0xff] }
 0x29f   :  { %1451 = vmatpush.bf16.msrb.mxu0 %v3597_v55  ;;  %4240 = vst [vmem:[#allocation41_spill] sm:$0xff] %v3611_v15  ;;  %v2713_v55 = vld [vmem:[#allocation8 + $0x34] sm:$0xf0] }
 0x2a0   :  { %1464 = vmatpush.bf16.msrb.mxu1 %v3599_v58  ;;  %4241 = vst [vmem:[#allocation42_spill] sm:$0xff] %v3613_v52  ;;  %v3619_v58 = vor.u32 %v2712_v40, %v2404_v8  ;;  %v3625_v53 = vor.u32 %v2713_v55, %v2412_v42  ;;  %v3639_v30 = vld [vmem:[#allocation7 + $0x78] sm:$0xff]  ;;  %v3651_v40 = vld [vmem:[#allocation7 + $0x70] sm:$0xff] }
 0x2a1   :  { %4242 = vst [vmem:[#allocation43_spill] sm:$0xff] %v3616_v35  ;;  %v3642_v55 = vld [vmem:[#allocation7 + $0xb8] sm:$0xff]  ;;  %v3657_v42 = vld [vmem:[#allocation7 + $0xf0] sm:$0xff] }
 0x2a2   :  { %4243 = vst [vmem:[#allocation44_spill] sm:$0xff] %v3619_v58  ;;  %1491 = vmatpush.bf16.msrb.mxu3 %v3616_v35  ;;  %1479 = vmatpush.bf16.msrb.mxu2 %v3625_v53  ;;  %v3645_v8 = vld [vmem:[#allocation7 + $0xf8] sm:$0xff] }
 0x2a3   :  { %1452 = vmatpush.bf16.msrb.mxu0 %v3607_v49  ;;  %4244 = vst [vmem:[#allocation45_spill] sm:$0xff] %v3623_v63 }
 0x2a4   :  { %1465 = vmatpush.bf16.msrb.mxu1 %v3611_v15  ;;  %4245 = vst [vmem:[#allocation46_spill] sm:$0xff] %v3625_v53 }
 0x2a5   :  { %4246 = vst [vmem:[#allocation47_spill] sm:$0xff] %v3628_v25 }
 0x2a6   :  { %1492 = vmatpush.bf16.msrb.mxu3 %v3628_v25  ;;  %4247 = vst [vmem:[#allocation48_spill] sm:$0xff] %v3636_v36 }
 0x2a7   :  { %1453 = vmatpush.bf16.msrb.mxu0 %v3619_v58  ;;  %4248 = vst [vmem:[#allocation49_spill] sm:$0xff] %v3639_v30 }
 0x2a8   :  { %1466 = vmatpush.bf16.msrb.mxu1 %v3623_v63  ;;  %4249 = vst [vmem:[#allocation50_spill] sm:$0xff] %v3642_v55 }
 0x2a9   :  { %4250 = vst [vmem:[#allocation51_spill] sm:$0xff] %v3645_v8 }
 0x2aa   :  { %4252 = vst [vmem:[#allocation53_spill] sm:$0xff] %v3651_v40 }
 0x2ab   :  { %4253 = vst [vmem:[#allocation54_spill] sm:$0xff] %v3654_v4 }
 0x2ac   :  { %4254 = vst [vmem:[#allocation55_spill] sm:$0xff] %v3657_v42 }
 0x303   :  { %v1070_v56 = vpop.xlane.xlu2 %1069 }
 0x304   :  { %v1071_v7 = vsub.f32 %v3489_v60, %v1070_v56  ;;  %v3660_v56 = vld [vmem:[#allocation7 + $0x28] sm:$0xff] }
 0x305   :  { %4255 = vst [vmem:[#allocation56_spill] sm:$0xff] %v3660_v56 }
 0x306   :  { %v1072_v12 = vmul.f32 %v1071_v7, %v3517_v38  ;;  %v3648_v38 = vld [vmem:[#allocation7 + $0x30] sm:$0xff]  ;;  %v3663_v7 = vld [vmem:[#allocation7 + $0x68] sm:$0xff] }
 0x307   :  { %4251 = vst [vmem:[#allocation52_spill] sm:$0xff] %v3648_v38 }
 0x308   :  { %v1073_v26 = vpack.c.bf16 %v1072_v12, %v1072_v12  ;;  %4256 = vst [vmem:[#allocation57_spill] sm:$0xff] %v3663_v7  ;;  %v3666_v12 = vld [vmem:[#allocation7 + $0xa8] sm:$0xff] }
 0x309   :  { %4257 = vst [vmem:[#allocation58_spill] sm:$0xff] %v3666_v12 }
 0x30a   :  { %1402 = vmatmul.bf16.vlgmr.msra.gmra.mxu0 %v1073_v26  ;;  %1415 = vmatmul.bf16.vlgmr.msra.gmra.mxu1 %v1073_v26 }
 0x30b   :  { %1428 = vmatmul.bf16.vlgmr.msra.gmra.mxu2 %v1073_v26  ;;  %1441 = vmatmul.bf16.vlgmr.msra.gmra.mxu3 %v1073_v26 }
 0x30c   :  { %1613 = vmatpush.bf16.msra.mxu0 %v3636_v36  ;;  %1626 = vmatpush.bf16.msra.mxu1 %v3639_v30 }
 0x30d   :  { %1639 = vmatpush.bf16.msra.mxu2 %v3642_v55  ;;  %1652 = vmatpush.bf16.msra.mxu3 %v3645_v8 }
 0x310   :  { %1614 = vmatpush.bf16.msra.mxu0 %v3648_v38  ;;  %1627 = vmatpush.bf16.msra.mxu1 %v3651_v40  ;;  %v3669_v40 = vld [vmem:[#allocation7 + $0xe8] sm:$0xff] }
 0x311   :  { %1640 = vmatpush.bf16.msra.mxu2 %v3654_v4  ;;  %1653 = vmatpush.bf16.msra.mxu3 %v3657_v42  ;;  %4258 = vst [vmem:[#allocation59_spill] sm:$0xff] %v3669_v40  ;;  %v3672_v4 = vld [vmem:[#allocation7 + $0x20] sm:$0xff] }
 0x312   :  { %4259 = vst [vmem:[#allocation60_spill] sm:$0xff] %v3672_v4  ;;  %v3675_v42 = vld [vmem:[#allocation7 + $0x60] sm:$0xff] }
 0x313   :  { %4260 = vst [vmem:[#allocation61_spill] sm:$0xff] %v3675_v42 }
 0x314   :  { %1615 = vmatpush.bf16.msra.mxu0 %v3660_v56  ;;  %1628 = vmatpush.bf16.msra.mxu1 %v3663_v7  ;;  %v3678_v56 = vld [vmem:[#allocation7 + $0xa0] sm:$0xff] }
 0x315   :  { %1641 = vmatpush.bf16.msra.mxu2 %v3666_v12  ;;  %1654 = vmatpush.bf16.msra.mxu3 %v3669_v40  ;;  %4261 = vst [vmem:[#allocation62_spill] sm:$0xff] %v3678_v56  ;;  %v3681_v7 = vld [vmem:[#allocation7 + $0xe0] sm:$0xff]  ;;  %v3684_v40 = vld [vmem:[#allocation7 + $0x18] sm:$0xff] }
 0x316   :  { %4262 = vst [vmem:[#allocation63_spill] sm:$0xff] %v3681_v7 }
 0x317   :  { %4263 = vst [vmem:[#allocation64_spill] sm:$0xff] %v3684_v40 }
 0x318   :  { %1616 = vmatpush.bf16.msra.mxu0 %v3672_v4  ;;  %1629 = vmatpush.bf16.msra.mxu1 %v3675_v42  ;;  %v3687_v4 = vld [vmem:[#allocation7 + $0x58] sm:$0xff] }
 0x319   :  { %1642 = vmatpush.bf16.msra.mxu2 %v3678_v56  ;;  %1655 = vmatpush.bf16.msra.mxu3 %v3681_v7  ;;  %4264 = vst [vmem:[#allocation65_spill] sm:$0xff] %v3687_v4  ;;  %v3690_v42 = vld [vmem:[#allocation7 + $0x98] sm:$0xff]  ;;  %v3696_v7 = vld [vmem:[#allocation7 + $0x10] sm:$0xff] }
 0x31a   :  { %1454 = vmatmul.bf16.vlgmr.msrb.gmra.mxu0 %v1073_v26  ;;  %1467 = vmatmul.bf16.vlgmr.msrb.gmra.mxu1 %v1073_v26  ;;  %4265 = vst [vmem:[#allocation66_spill] sm:$0xff] %v3690_v42  ;;  %v3693_v56 = vld [vmem:[#allocation7 + $0xd8] sm:$0xff] }
 0x31b   :  { %1480 = vmatmul.bf16.vlgmr.msrb.gmra.mxu2 %v1073_v26  ;;  %1493 = vmatmul.bf16.vlgmr.msrb.gmra.mxu3 %v1073_v26  ;;  %4266 = vst [vmem:[#allocation67_spill] sm:$0xff] %v3693_v56  ;;  %v3699_v26 = vld [vmem:[#allocation7 + $0x50] sm:$0xff] }
 0x31c   :  { %1617 = vmatpush.bf16.msra.mxu0 %v3684_v40  ;;  %1630 = vmatpush.bf16.msra.mxu1 %v3687_v4  ;;  %4267 = vst [vmem:[#allocation68_spill] sm:$0xff] %v3696_v7  ;;  %v3702_v40 = vld [vmem:[#allocation7 + $0x90] sm:$0xff] }
 0x31d   :  { %1643 = vmatpush.bf16.msra.mxu2 %v3690_v42  ;;  %1656 = vmatpush.bf16.msra.mxu3 %v3693_v56  ;;  %4268 = vst [vmem:[#allocation69_spill] sm:$0xff] %v3699_v26  ;;  %v3705_v4 = vld [vmem:[#allocation7 + $0xd0] sm:$0xff]  ;;  %v3708_v42 = vld [vmem:[#allocation7 + $0x8] sm:$0xff] }
 0x31e   :  { %4269 = vst [vmem:[#allocation70_spill] sm:$0xff] %v3702_v40  ;;  %v3711_v56 = vld [vmem:[#allocation7 + $0x48] sm:$0xff] }
 0x31f   :  { %4270 = vst [vmem:[#allocation71_spill] sm:$0xff] %v3705_v4 }
 0x320   :  { %1618 = vmatpush.bf16.msra.mxu0 %v3696_v7  ;;  %1631 = vmatpush.bf16.msra.mxu1 %v3699_v26  ;;  %4271 = vst [vmem:[#allocation72_spill] sm:$0xff] %v3708_v42  ;;  %v3714_v7 = vld [vmem:[#allocation7 + $0x88] sm:$0xff] }
 0x321   :  { %1644 = vmatpush.bf16.msra.mxu2 %v3702_v40  ;;  %1657 = vmatpush.bf16.msra.mxu3 %v3705_v4  ;;  %4272 = vst [vmem:[#allocation73_spill] sm:$0xff] %v3711_v56  ;;  %v3717_v26 = vld [vmem:[#allocation7 + $0xc8] sm:$0xff]  ;;  %v3720_v40 = vld [vmem:[#allocation7] sm:$0xff] }
 0x322   :  { %4273 = vst [vmem:[#allocation74_spill] sm:$0xff] %v3714_v7  ;;  %v3723_v4 = vld [vmem:[#allocation7 + $0x40] sm:$0xff] }
 0x323   :  { %4274 = vst [vmem:[#allocation75_spill] sm:$0xff] %v3717_v26 }
 0x324   :  { %1619 = vmatpush.bf16.msra.mxu0 %v3708_v42  ;;  %1632 = vmatpush.bf16.msra.mxu1 %v3711_v56  ;;  %4275 = vst [vmem:[#allocation76_spill] sm:$0xff] %v3720_v40  ;;  %v3726_v42 = vld [vmem:[#allocation7 + $0x80] sm:$0xff] }
 0x325   :  { %1645 = vmatpush.bf16.msra.mxu2 %v3714_v7  ;;  %1658 = vmatpush.bf16.msra.mxu3 %v3717_v26  ;;  %4276 = vst [vmem:[#allocation77_spill] sm:$0xff] %v3723_v4  ;;  %v3729_v56 = vld [vmem:[#allocation7 + $0xc0] sm:$0xff]  ;;  %v3732_v7 = vld [vmem:[#allocation7 + $0x138] sm:$0xff] }
 0x326   :  { %4277 = vst [vmem:[#allocation78_spill] sm:$0xff] %v3726_v42  ;;  %v3735_v26 = vld [vmem:[#allocation7 + $0x178] sm:$0xff] }
 0x327   :  { %4278 = vst [vmem:[#allocation79_spill] sm:$0xff] %v3729_v56 }
 0x328   :  { %1620 = vmatpush.bf16.msra.mxu0 %v3720_v40  ;;  %1633 = vmatpush.bf16.msra.mxu1 %v3723_v4  ;;  %4279 = vst [vmem:[#allocation80_spill] sm:$0xff] %v3732_v7  ;;  %v3738_v40 = vld [vmem:[#allocation7 + $0x1b8] sm:$0xff] }
 0x329   :  { %1646 = vmatpush.bf16.msra.mxu2 %v3726_v42  ;;  %1659 = vmatpush.bf16.msra.mxu3 %v3729_v56  ;;  %4280 = vst [vmem:[#allocation81_spill] sm:$0xff] %v3735_v26  ;;  %v3741_v4 = vld [vmem:[#allocation7 + $0x1f8] sm:$0xff]  ;;  %v3744_v42 = vld [vmem:[#allocation7 + $0x130] sm:$0xff] }
 0x32a   :  { %4281 = vst [vmem:[#allocation82_spill] sm:$0xff] %v3738_v40  ;;  %v3747_v56 = vld [vmem:[#allocation7 + $0x170] sm:$0xff] }
 0x32b   :  { %4282 = vst [vmem:[#allocation83_spill] sm:$0xff] %v3741_v4 }
 0x32c   :  { %1665 = vmatpush.bf16.msrb.mxu0 %v3732_v7  ;;  %1678 = vmatpush.bf16.msrb.mxu1 %v3735_v26  ;;  %4283 = vst [vmem:[#allocation84_spill] sm:$0xff] %v3744_v42  ;;  %v3750_v7 = vld [vmem:[#allocation7 + $0x1b0] sm:$0xff] }
 0x32d   :  { %1691 = vmatpush.bf16.msrb.mxu2 %v3738_v40  ;;  %1704 = vmatpush.bf16.msrb.mxu3 %v3741_v4  ;;  %4284 = vst [vmem:[#allocation85_spill] sm:$0xff] %v3747_v56  ;;  %v3753_v26 = vld [vmem:[#allocation7 + $0x1f0] sm:$0xff]  ;;  %v3756_v40 = vld [vmem:[#allocation7 + $0x128] sm:$0xff] }
 0x32e   :  { %4285 = vst [vmem:[#allocation86_spill] sm:$0xff] %v3750_v7  ;;  %v3759_v4 = vld [vmem:[#allocation7 + $0x168] sm:$0xff] }
 0x32f   :  { %4286 = vst [vmem:[#allocation87_spill] sm:$0xff] %v3753_v26 }
 0x330   :  { %1666 = vmatpush.bf16.msrb.mxu0 %v3744_v42  ;;  %1679 = vmatpush.bf16.msrb.mxu1 %v3747_v56  ;;  %4287 = vst [vmem:[#allocation88_spill] sm:$0xff] %v3756_v40  ;;  %v3762_v42 = vld [vmem:[#allocation7 + $0x1a8] sm:$0xff] }
 0x331   :  { %1692 = vmatpush.bf16.msrb.mxu2 %v3750_v7  ;;  %1705 = vmatpush.bf16.msrb.mxu3 %v3753_v26  ;;  %4288 = vst [vmem:[#allocation89_spill] sm:$0xff] %v3759_v4  ;;  %v3765_v56 = vld [vmem:[#allocation7 + $0x1e8] sm:$0xff]  ;;  %v3768_v7 = vld [vmem:[#allocation7 + $0x120] sm:$0xff] }
 0x332   :  { %4289 = vst [vmem:[#allocation90_spill] sm:$0xff] %v3762_v42  ;;  %v3771_v26 = vld [vmem:[#allocation7 + $0x160] sm:$0xff] }
 0x333   :  { %4290 = vst [vmem:[#allocation91_spill] sm:$0xff] %v3765_v56 }
 0x334   :  { %1667 = vmatpush.bf16.msrb.mxu0 %v3756_v40  ;;  %1680 = vmatpush.bf16.msrb.mxu1 %v3759_v4  ;;  %4291 = vst [vmem:[#allocation92_spill] sm:$0xff] %v3768_v7  ;;  %v3774_v40 = vld [vmem:[#allocation7 + $0x1a0] sm:$0xff] }
 0x335   :  { %1693 = vmatpush.bf16.msrb.mxu2 %v3762_v42  ;;  %1706 = vmatpush.bf16.msrb.mxu3 %v3765_v56  ;;  %4292 = vst [vmem:[#allocation93_spill] sm:$0xff] %v3771_v26  ;;  %v3777_v4 = vld [vmem:[#allocation7 + $0x1e0] sm:$0xff]  ;;  %v3780_v42 = vld [vmem:[#allocation7 + $0x118] sm:$0xff] }
 0x336   :  { %4293 = vst [vmem:[#allocation94_spill] sm:$0xff] %v3774_v40  ;;  %v3783_v56 = vld [vmem:[#allocation7 + $0x158] sm:$0xff] }
 0x337   :  { %4294 = vst [vmem:[#allocation95_spill] sm:$0xff] %v3777_v4 }
 0x338   :  { %1668 = vmatpush.bf16.msrb.mxu0 %v3768_v7  ;;  %1681 = vmatpush.bf16.msrb.mxu1 %v3771_v26  ;;  %4295 = vst [vmem:[#allocation96_spill] sm:$0xff] %v3780_v42  ;;  %v3786_v7 = vld [vmem:[#allocation7 + $0x198] sm:$0xff] }
 0x339   :  { %1694 = vmatpush.bf16.msrb.mxu2 %v3774_v40  ;;  %1707 = vmatpush.bf16.msrb.mxu3 %v3777_v4  ;;  %4296 = vst [vmem:[#allocation97_spill] sm:$0xff] %v3783_v56  ;;  %v3789_v26 = vld [vmem:[#allocation7 + $0x1d8] sm:$0xff]  ;;  %v3792_v40 = vld [vmem:[#allocation7 + $0x110] sm:$0xff] }
 0x33a   :  { %4297 = vst [vmem:[#allocation98_spill] sm:$0xff] %v3786_v7  ;;  %v3795_v4 = vld [vmem:[#allocation7 + $0x150] sm:$0xff] }
 0x33b   :  { %4298 = vst [vmem:[#allocation99_spill] sm:$0xff] %v3789_v26 }
 0x33c   :  { %1669 = vmatpush.bf16.msrb.mxu0 %v3780_v42  ;;  %1682 = vmatpush.bf16.msrb.mxu1 %v3783_v56  ;;  %4299 = vst [vmem:[#allocation100_spill] sm:$0xff] %v3792_v40  ;;  %v3798_v42 = vld [vmem:[#allocation7 + $0x190] sm:$0xff] }
 0x33d   :  { %1695 = vmatpush.bf16.msrb.mxu2 %v3786_v7  ;;  %1708 = vmatpush.bf16.msrb.mxu3 %v3789_v26  ;;  %4300 = vst [vmem:[#allocation101_spill] sm:$0xff] %v3795_v4  ;;  %v3801_v56 = vld [vmem:[#allocation7 + $0x1d0] sm:$0xff]  ;;  %v3804_v7 = vld [vmem:[#allocation7 + $0x108] sm:$0xff] }
 0x33e   :  { %4301 = vst [vmem:[#allocation102_spill] sm:$0xff] %v3798_v42  ;;  %v3807_v26 = vld [vmem:[#allocation7 + $0x148] sm:$0xff] }
 0x33f   :  { %4302 = vst [vmem:[#allocation103_spill] sm:$0xff] %v3801_v56 }
 0x340   :  { %1670 = vmatpush.bf16.msrb.mxu0 %v3792_v40  ;;  %1683 = vmatpush.bf16.msrb.mxu1 %v3795_v4  ;;  %4303 = vst [vmem:[#allocation104_spill] sm:$0xff] %v3804_v7  ;;  %v3810_v40 = vld [vmem:[#allocation7 + $0x188] sm:$0xff] }
 0x341   :  { %1696 = vmatpush.bf16.msrb.mxu2 %v3798_v42  ;;  %1709 = vmatpush.bf16.msrb.mxu3 %v3801_v56  ;;  %4304 = vst [vmem:[#allocation105_spill] sm:$0xff] %v3807_v26  ;;  %v3813_v4 = vld [vmem:[#allocation7 + $0x1c8] sm:$0xff]  ;;  %v3816_v42 = vld [vmem:[#allocation7 + $0x100] sm:$0xff] }
 0x342   :  { %4305 = vst [vmem:[#allocation106_spill] sm:$0xff] %v3810_v40  ;;  %v3819_v56 = vld [vmem:[#allocation7 + $0x140] sm:$0xff] }
 0x343   :  { %4306 = vst [vmem:[#allocation107_spill] sm:$0xff] %v3813_v4 }
 0x344   :  { %1671 = vmatpush.bf16.msrb.mxu0 %v3804_v7  ;;  %1684 = vmatpush.bf16.msrb.mxu1 %v3807_v26  ;;  %4307 = vst [vmem:[#allocation108_spill] sm:$0xff] %v3816_v42  ;;  %v3822_v7 = vld [vmem:[#allocation7 + $0x180] sm:$0xff] }
 0x345   :  { %1697 = vmatpush.bf16.msrb.mxu2 %v3810_v40  ;;  %1710 = vmatpush.bf16.msrb.mxu3 %v3813_v4  ;;  %4308 = vst [vmem:[#allocation109_spill] sm:$0xff] %v3819_v56  ;;  %v3825_v26 = vld [vmem:[#allocation7 + $0x1c0] sm:$0xff] }
 0x346   :  { %4309 = vst [vmem:[#allocation110_spill] sm:$0xff] %v3822_v7 }
 0x347   :  { %4310 = vst [vmem:[#allocation111_spill] sm:$0xff] %v3825_v26 }
 0x348   :  { %1672 = vmatpush.bf16.msrb.mxu0 %v3816_v42  ;;  %1685 = vmatpush.bf16.msrb.mxu1 %v3819_v56 }
 0x349   :  { %1698 = vmatpush.bf16.msrb.mxu2 %v3822_v7  ;;  %1711 = vmatpush.bf16.msrb.mxu3 %v3825_v26 }
 0x387   :  { %v3828_v40 = vpop.f32.mrf.mxu0  ;;  %v3830_v12 = vpop.f32.mrf.mxu1 }
 0x388   :  { %v1498_v4 = vmul.f32 %v3828_v40, %v3828_v40  ;;  %v1499_v42 = vmul.f32 %v3830_v12, %v3830_v12 }
 0x38a   :  { %v1506_v26 = vsel %vm801_vm0, %v1498_v4, 0.0  ;;  %v1507_v30 = vsel %vm801_vm0, %v1499_v42, 0.0 }
 0x38b   :  { %v1508_v60 = vadd.f32 %v1507_v30, %v1506_v26 }
 0x38e   :  { %v3836_v38 = vpop.f32.mrf.mxu2  ;;  %v3838_v56 = vpop.f32.mrf.mxu3 }
 0x38f   :  { %v1500_v7 = vmul.f32 %v3836_v38, %v3836_v38  ;;  %v1405_v8 = vpop.f32.mrf.mxu0  ;;  %v1418_v55 = vpop.f32.mrf.mxu1  ;;  %v1501_v25 = vmul.f32 %v3838_v56, %v3838_v56 }
 0x391   :  { %v1509_v36 = vsel %vm801_vm0, %v1500_v7, 0.0  ;;  %v1511_v55 = vsel %vm801_vm0, %v1501_v25, 0.0 }
 0x392   :  { %v1510_v53 = vadd.f32 %v1509_v36, %v1508_v60 }
 0x394   :  { %v1512_v4 = vadd.f32 %v1511_v55, %v1510_v53 }
 0x396   :  { %v1431_v63 = vpop.f32.mrf.mxu2  ;;  %v1444_v58 = vpop.f32.mrf.mxu3 }
 0x397   :  { %v3847_v35 = vpop.f32.mrf.mxu0  ;;  %v1468_v52 = vpop.f32.mrf.mxu1 }
 0x398   :  { %v1502_v8 = vmul.f32 %v3847_v35, %v3847_v35  ;;  %v1503_v15 = vmul.f32 %v1468_v52, %v1468_v52 }
 0x39a   :  { %v1513_v42 = vsel %vm801_vm0, %v1502_v8, 0.0  ;;  %v1515_v49 = vsel %vm801_vm0, %v1503_v15, 0.0 }
 0x39b   :  { %v1514_v7 = vadd.f32 %v1513_v42, %v1512_v4 }
 0x39d   :  { %v1516_v50 = vadd.f32 %v1515_v49, %v1514_v7 }
 0x39e   :  { %v1481_v30 = vpop.f32.mrf.mxu2  ;;  %v1494_v26 = vpop.f32.mrf.mxu3 }
 0x39f   :  { %v1504_v60 = vmul.f32 %v1481_v30, %v1481_v30  ;;  %v1505_v63 = vmul.f32 %v1494_v26, %v1494_v26  ;;  %v1457_v58 = vpop.f32.mrf.mxu0  ;;  %v1470_v36 = vpop.f32.mrf.mxu1 }
 0x3a1   :  { %v1517_v19 = vsel %vm801_vm0, %v1504_v60, 0.0  ;;  %v1519_v21 = vsel %vm801_vm0, %v1505_v63, 0.0 }
 0x3a2   :  { %v1518_v34 = vadd.f32 %v1517_v19, %v1516_v50 }
 0x3a4   :  { %v1520_v25 = vadd.f32 %v1519_v21, %v1518_v34 }
 0x3a6   :  { %v1483_v53 = vpop.f32.mrf.mxu2  ;;  %v1496_v55 = vpop.f32.mrf.mxu3  ;;  %1521 = vadd.xlane.f32.xlu0 %v1520_v25 }
 0x419   :  { %v1522_v8 = vpop.xlane.xlu0 %1521 }
 0x41a   :  { %2795 = vrsqrt.f32 %v1522_v8  ;;  %vm1530_vm1 = vcmp.eq.f32.partialorder %v1522_v8, inf  ;;  %v1533_v49 = vand.u32 2147483648, %v1522_v8  ;;  %vm1532_vm2 = vcmp.eq.f32.partialorder %v1522_v8, 0.0 }
 0x420   :  { %v2796_v4 = vpop.eup %2795 }
 0x421   :  { %v1524_v42 = vmul.f32 %v2796_v4, %v1522_v8 }
 0x423   :  { %v1525_v20 = vmul.f32 %v2796_v4, %v1524_v42 }
 0x425   :  { %v1526_v15 = vmul.f32 0.5, %v1525_v20 }
 0x427   :  { %v1527_v59 = vsub.f32 1.5, %v1526_v15 }
 0x429   :  { %v1528_v57 = vmul.f32 %v2796_v4, %v1527_v59 }
 0x42b   :  { %v1529_v58 = vmul.f32 %v1528_v57, %v1522_v8 }
 0x42d   :  { %v1531_v7 = vsel %vm1530_vm1, %v1522_v8, %v1529_v58 }
 0x42e   :  { %v1534_v50 = vsel %vm1532_vm2, %v1533_v49, %v1531_v7 }
 0x42f   :  { %v1535_v19 = vadd.f32 1e-08, %v1534_v50 }
 0x431   :  { %2797 = vrcp.f32 %v1535_v19  ;;  %v1547_v63 = vand.u32 2147483648, %v1535_v19  ;;  %v1545_v25 = vand.u32 2147483647, %v1535_v19  ;;  %vm1541_vm5 = vweird.f32 %v1535_v19 }
 0x433   :  { %v1548_v20 = vor.u32 1.1754944e-38, %v1547_v63  ;;  %vm1546_vm7 = vcmp.eq.f32.partialorder %v1545_v25, 8.507059e+37 }
 0x437   :  { %v2798_v21 = vpop.eup %2797 }
 0x438   :  { %v1537_v34 = vmul.f32 %v2798_v21, %v1535_v19  ;;  %vm1542_vm4 = vweird.f32 %v2798_v21 }
 0x439   :  { %vm1543_vm6 = vmor %vm1541_vm5, %vm1542_vm4 }
 0x43a   :  { %v1538_v60 = vsub.f32 1.0, %v1537_v34 }
 0x43c   :  { %v1539_v36 = vmul.f32 %v2798_v21, %v1538_v60 }
 0x43e   :  { %v1540_v53 = vadd.f32 %v2798_v21, %v1539_v36 }
 0x440   :  { %v1544_v59 = vsel %vm1543_vm6, %v2798_v21, %v1540_v53 }
 0x441   :  { %v1549_v57 = vsel %vm1546_vm7, %v1548_v20, %v1544_v59 }
 0x442   :  { %v1551_v55 = vmul.f32 %v1549_v57, %v3830_v12  ;;  %v1552_v8 = vmul.f32 %v1549_v57, %v3836_v38  ;;  %v1553_v4 = vmul.f32 %v1549_v57, %v3838_v56  ;;  %v1555_v42 = vmul.f32 %v1549_v57, %v1468_v52 }
 0x443   :  { %v1556_v15 = vmul.f32 %v1549_v57, %v1481_v30  ;;  %v1557_v58 = vmul.f32 %v1549_v57, %v1494_v26  ;;  %v1550_v49 = vmul.f32 %v1549_v57, %v3828_v40  ;;  %v1554_v21 = vmul.f32 %v1549_v57, %v3847_v35 }
 0x444   :  { %v1566_v7 = vrot.slane %v1551_v55, 6  ;;  %v1567_v50 = vrot.slane %v1552_v8, 4  ;;  %v1568_v19 = vrot.slane %v1553_v4, 2  ;;  %v1569_v34 = vrot.slane %v1555_v42, 6  ;;  %v4338_v42 = vld [vmem:[#allocation45_spill] sm:$0xff] }
 0x445   :  { %v1570_v60 = vrot.slane %v1556_v15, 4  ;;  %v1571_v63 = vrot.slane %v1557_v58, 2  ;;  %v4339_v15 = vld [vmem:[#allocation46_spill] sm:$0xff]  ;;  %v4340_v58 = vld [vmem:[#allocation47_spill] sm:$0xff] }
 0x446   :  { %v1572_v12 = vsel %vm801_vm0, %v1550_v49, %v1566_v7  ;;  %v1574_v38 = vsel %vm1573_vm8, %v1567_v50, %v1568_v19  ;;  %v1577_v52 = vsel %vm801_vm0, %v1554_v21, %v1569_v34  ;;  %v3936_v50 = vld [vmem:[%s4068_s4] ss:$0 sm:$0xff]  ;;  %s3015_s4 = smov [#allocation10]  }
 0x447   :  { %v1576_v56 = vsel %vm1575_vm9, %v1572_v12, %v1574_v38  ;;  %v1578_v30 = vsel %vm1573_vm8, %v1570_v60, %v1571_v63  ;;  %s2116_s17 = sshll.u32 %s3015_s4, 4  ;;  %s2117_s17 = int_to_ptr.vmem [resolvable:$true] %s2116_s17 }
 0x448   :  { %v1579_v40 = vsel %vm1575_vm9, %v1577_v52, %v1578_v30  ;;  %v1582_v26 = vadd.f32 %v1576_v56, %v4207_v3 }
 0x449   :  { %v1583_v36 = vadd.f32 %v1579_v40, %v4208_v5 }
 0x44a   :  { %1586 = vst [vmem:[#allocation1] ss:$4 sm:$0xff] %v1582_v26 }
 0x44b   :  { %1588 = vst [vmem:[#allocation1 + $0x20] ss:$4 sm:$0xff] %v1583_v36 }
 0x451   :  { %v1589_v35 = vld.sshfl [vmem:[#allocation1] sm:$0xff pattern:$0x73625140]  ;;  %v1590_v25 = vld.sshfl [vmem:[#allocation1 + $0x8] sm:$0xff pattern:$0x73625140] }
 0x452   :  { %v1605_v53 = vpack.c.bf16 %v1589_v35, %v1589_v35  ;;  %v1606_v20 = vpack.c.bf16 %v1590_v25, %v1590_v25  ;;  %v1591_v59 = vld.sshfl [vmem:[#allocation1 + $0x10] sm:$0xff pattern:$0x73625140]  ;;  %v1592_v57 = vld.sshfl [vmem:[#allocation1 + $0x18] sm:$0xff pattern:$0x73625140] }
 0x453   :  { %v1607_v55 = vpack.c.bf16 %v1591_v59, %v1591_v59  ;;  %v1608_v8 = vpack.c.bf16 %v1592_v57, %v1592_v57  ;;  %v1593_v4 = vld.sshfl [vmem:[#allocation1 + $0x20] sm:$0xff pattern:$0x73625140] }
 0x454   :  { %1621 = vmatmul.bf16.vlgmr.msra.gmra.mxu0 %v1605_v53  ;;  %1634 = vmatmul.bf16.vlgmr.msra.gmra.mxu1 %v1606_v20 }
 0x455   :  { %1647 = vmatmul.bf16.vlgmr.msra.gmra.mxu2 %v1607_v55  ;;  %1660 = vmatmul.bf16.vlgmr.msra.gmra.mxu3 %v1608_v8 }
 0x456   :  { %1749 = vmatpush.bf16.msra.mxu0 %v3396_v6  ;;  %1762 = vmatpush.bf16.msra.mxu1 %v3398_v10  ;;  %v1594_v6 = vld.sshfl [vmem:[#allocation1 + $0x28] sm:$0xff pattern:$0x73625140]  ;;  %v1595_v10 = vld.sshfl [vmem:[#allocation1 + $0x30] sm:$0xff pattern:$0x73625140] }
 0x457   :  { %1775 = vmatpush.bf16.msra.mxu2 %v3400_v11  ;;  %1788 = vmatpush.bf16.msra.mxu3 %v3403_v17  ;;  %v1596_v11 = vld.sshfl [vmem:[#allocation1 + $0x38] sm:$0xff pattern:$0x73625140]  ;;  %v1609_v17 = vpack.c.bf16 %v1593_v4, %v1593_v4 }
 0x45a   :  { %1750 = vmatpush.bf16.msra.mxu0 %v3408_v22  ;;  %1763 = vmatpush.bf16.msra.mxu1 %v3410_v23  ;;  %v1610_v22 = vpack.c.bf16 %v1594_v6, %v1594_v6  ;;  %v1611_v23 = vpack.c.bf16 %v1595_v10, %v1595_v10 }
 0x45b   :  { %1776 = vmatpush.bf16.msra.mxu2 %v3413_v27  ;;  %1789 = vmatpush.bf16.msra.mxu3 %v3415_v37  ;;  %v1612_v27 = vpack.c.bf16 %v1596_v11, %v1596_v11  ;;  %v4311_v37 = vld [vmem:[#allocation23_spill] sm:$0xff] }
 0x45e   :  { %1751 = vmatpush.bf16.msra.mxu0 %v3418_v41  ;;  %1764 = vmatpush.bf16.msra.mxu1 %v3424_v46  ;;  %v4312_v41 = vld [vmem:[#allocation24_spill] sm:$0xff]  ;;  %v4313_v46 = vld [vmem:[#allocation22_spill] sm:$0xff] }
 0x45f   :  { %1777 = vmatpush.bf16.msra.mxu2 %v3426_v47  ;;  %1790 = vmatpush.bf16.msra.mxu3 %v3431_v16  ;;  %v4314_v47 = vld [vmem:[#allocation25_spill] sm:$0xff]  ;;  %v4315_v16 = vld [vmem:[#allocation26_spill] sm:$0xff] }
 0x462   :  { %1752 = vmatpush.bf16.msra.mxu0 %v3443_v61  ;;  %1765 = vmatpush.bf16.msra.mxu1 %v3450_v62  ;;  %v4316_v61 = vld [vmem:[#allocation17_spill] sm:$0xff]  ;;  %v4317_v62 = vld [vmem:[#allocation18_spill] sm:$0xff] }
 0x463   :  { %1778 = vmatpush.bf16.msra.mxu2 %v3452_v32  ;;  %1791 = vmatpush.bf16.msra.mxu3 %v3455_v0  ;;  %v4318_v32 = vld [vmem:[#allocation15_spill] sm:$0xff]  ;;  %v4319_v0 = vld [vmem:[#allocation16_spill] sm:$0xff] }
 0x464   :  { %1673 = vmatmul.bf16.vlgmr.msrb.gmra.mxu0 %v1609_v17  ;;  %1686 = vmatmul.bf16.vlgmr.msrb.gmra.mxu1 %v1610_v22 }
 0x465   :  { %1699 = vmatmul.bf16.vlgmr.msrb.gmra.mxu2 %v1611_v23  ;;  %1712 = vmatmul.bf16.vlgmr.msrb.gmra.mxu3 %v1612_v27 }
 0x466   :  { %1753 = vmatpush.bf16.msra.mxu0 %v3458_v9  ;;  %1766 = vmatpush.bf16.msra.mxu1 %v3462_v13  ;;  %v4320_v9 = vld [vmem:[#allocation27_spill] sm:$0xff]  ;;  %v4321_v13 = vld [vmem:[#allocation28_spill] sm:$0xff] }
 0x467   :  { %1779 = vmatpush.bf16.msra.mxu2 %v3464_v14  ;;  %1792 = vmatpush.bf16.msra.mxu3 %v3468_v24  ;;  %v4322_v14 = vld [vmem:[#allocation29_spill] sm:$0xff]  ;;  %v4323_v24 = vld [vmem:[#allocation30_spill] sm:$0xff] }
 0x46a   :  { %1754 = vmatpush.bf16.msra.mxu0 %v3476_v43  ;;  %1767 = vmatpush.bf16.msra.mxu1 %v3480_v44  ;;  %v4324_v43 = vld [vmem:[#allocation31_spill] sm:$0xff]  ;;  %v4325_v44 = vld [vmem:[#allocation32_spill] sm:$0xff] }
 0x46b   :  { %1780 = vmatpush.bf16.msra.mxu2 %v3482_v48  ;;  %1793 = vmatpush.bf16.msra.mxu3 %v3485_v31  ;;  %v4326_v48 = vld [vmem:[#allocation33_spill] sm:$0xff]  ;;  %v4327_v31 = vld [vmem:[#allocation34_spill] sm:$0xff] }
 0x46e   :  { %1755 = vmatpush.bf16.msra.mxu0 %v3501_v54  ;;  %1768 = vmatpush.bf16.msra.mxu1 %v3505_v1  ;;  %v4328_v54 = vld [vmem:[#allocation35_spill] sm:$0xff]  ;;  %v4329_v1 = vld [vmem:[#allocation36_spill] sm:$0xff] }
 0x46f   :  { %1781 = vmatpush.bf16.msra.mxu2 %v3507_v2  ;;  %1794 = vmatpush.bf16.msra.mxu3 %v3512_v18  ;;  %v4330_v2 = vld [vmem:[#allocation37_spill] sm:$0xff]  ;;  %v4331_v18 = vld [vmem:[#allocation38_spill] sm:$0xff] }
 0x472   :  { %1756 = vmatpush.bf16.msra.mxu0 %v3520_v39  ;;  %1769 = vmatpush.bf16.msra.mxu1 %v3524_v45  ;;  %v4332_v39 = vld [vmem:[#allocation39_spill] sm:$0xff]  ;;  %v4333_v45 = vld [vmem:[#allocation40_spill] sm:$0xff] }
 0x473   :  { %1782 = vmatpush.bf16.msra.mxu2 %v3529_v33  ;;  %1795 = vmatpush.bf16.msra.mxu3 %v3531_v29  ;;  %v4334_v33 = vld [vmem:[#allocation41_spill] sm:$0xff]  ;;  %v4335_v29 = vld [vmem:[#allocation42_spill] sm:$0xff] }
 0x476   :  { %1801 = vmatpush.bf16.msrb.mxu0 %v3533_v51  ;;  %1814 = vmatpush.bf16.msrb.mxu1 %v3535_v28  ;;  %v4336_v51 = vld [vmem:[#allocation43_spill] sm:$0xff]  ;;  %v4337_v28 = vld [vmem:[#allocation44_spill] sm:$0xff] }
 0x477   :  { %1827 = vmatpush.bf16.msrb.mxu2 %v4311_v37  ;;  %1840 = vmatpush.bf16.msrb.mxu3 %v4312_v41 }
 0x47a   :  { %1802 = vmatpush.bf16.msrb.mxu0 %v4313_v46  ;;  %1815 = vmatpush.bf16.msrb.mxu1 %v4314_v47 }
 0x47b   :  { %1828 = vmatpush.bf16.msrb.mxu2 %v4315_v16  ;;  %1841 = vmatpush.bf16.msrb.mxu3 %v4316_v61 }
 0x47e   :  { %1803 = vmatpush.bf16.msrb.mxu0 %v4317_v62  ;;  %1816 = vmatpush.bf16.msrb.mxu1 %v4318_v32 }
 0x47f   :  { %1829 = vmatpush.bf16.msrb.mxu2 %v4319_v0  ;;  %1842 = vmatpush.bf16.msrb.mxu3 %v4320_v9 }
 0x482   :  { %1804 = vmatpush.bf16.msrb.mxu0 %v4321_v13  ;;  %1817 = vmatpush.bf16.msrb.mxu1 %v4322_v14 }
 0x483   :  { %1830 = vmatpush.bf16.msrb.mxu2 %v4323_v24  ;;  %1843 = vmatpush.bf16.msrb.mxu3 %v4324_v43  ;;  %v4342_v43 = vld [vmem:[#allocation21_spill] sm:$0xff] }
 0x486   :  { %1805 = vmatpush.bf16.msrb.mxu0 %v4325_v44  ;;  %1818 = vmatpush.bf16.msrb.mxu1 %v4326_v48 }
 0x487   :  { %1831 = vmatpush.bf16.msrb.mxu2 %v4327_v31  ;;  %1844 = vmatpush.bf16.msrb.mxu3 %v4328_v54 }
 0x48a   :  { %1806 = vmatpush.bf16.msrb.mxu0 %v4329_v1  ;;  %1819 = vmatpush.bf16.msrb.mxu1 %v4330_v2 }
 0x48b   :  { %1832 = vmatpush.bf16.msrb.mxu2 %v4331_v18  ;;  %1845 = vmatpush.bf16.msrb.mxu3 %v4332_v39  ;;  %v4343_v18 = vld [vmem:[#allocation48_spill] sm:$0xff]  ;;  %v4344_v39 = vld [vmem:[#allocation49_spill] sm:$0xff] }
 0x48e   :  { %1807 = vmatpush.bf16.msrb.mxu0 %v4333_v45  ;;  %1820 = vmatpush.bf16.msrb.mxu1 %v4334_v33  ;;  %v4345_v45 = vld [vmem:[#allocation50_spill] sm:$0xff]  ;;  %v4346_v33 = vld [vmem:[#allocation51_spill] sm:$0xff] }
 0x48f   :  { %1833 = vmatpush.bf16.msrb.mxu2 %v4335_v29  ;;  %1846 = vmatpush.bf16.msrb.mxu3 %v4336_v51  ;;  %v4347_v29 = vld [vmem:[#allocation52_spill] sm:$0xff]  ;;  %v4348_v51 = vld [vmem:[#allocation53_spill] sm:$0xff] }
 0x492   :  { %1808 = vmatpush.bf16.msrb.mxu0 %v4337_v28  ;;  %1821 = vmatpush.bf16.msrb.mxu1 %v4338_v42  ;;  %v4349_v28 = vld [vmem:[#allocation54_spill] sm:$0xff]  ;;  %v4350_v42 = vld [vmem:[#allocation55_spill] sm:$0xff] }
 0x493   :  { %1834 = vmatpush.bf16.msrb.mxu2 %v4339_v15  ;;  %1847 = vmatpush.bf16.msrb.mxu3 %v4340_v58  ;;  %v4351_v15 = vld [vmem:[#allocation56_spill] sm:$0xff]  ;;  %v4352_v58 = vld [vmem:[#allocation57_spill] sm:$0xff] }
 0x4d1   :  { %v1622_v49 = vpop.f32.mrf.mxu0  ;;  %v1635_v7 = vpop.f32.mrf.mxu1 }
 0x4d2   :  { %v1623_v19 = vadd.f32 %v3936_v50, %v1622_v49  ;;  %v4353_v49 = vld [vmem:[#allocation58_spill] sm:$0xff] }
 0x4d4   :  { %v1636_v12 = vadd.f32 %v1635_v7, %v1623_v19  ;;  %v4354_v7 = vld [vmem:[#allocation59_spill] sm:$0xff]  ;;  %v4355_v19 = vld [vmem:[#allocation60_spill] sm:$0xff] }
 0x4d8   :  { %v1648_v21 = vpop.f32.mrf.mxu2  ;;  %v1661_v34 = vpop.f32.mrf.mxu3 }
 0x4d9   :  { %v1624_v60 = vpop.f32.mrf.mxu0  ;;  %v1637_v63 = vpop.f32.mrf.mxu1  ;;  %v1649_v38 = vadd.f32 %v1648_v21, %v1636_v12  ;;  %v4356_v21 = vld [vmem:[#allocation61_spill] sm:$0xff] }
 0x4da   :  { %v4358_v60 = vld [vmem:[#allocation63_spill] sm:$0xff]  ;;  %v4359_v63 = vld [vmem:[#allocation64_spill] sm:$0xff]  ;;  %v4360_v12 = vld [vmem:[#allocation65_spill] sm:$0xff] }
 0x4db   :  { %v1662_v30 = vadd.f32 %v1661_v34, %v1649_v38  ;;  %v4357_v34 = vld [vmem:[#allocation62_spill] sm:$0xff] }
 0x4dc   :  { %v4361_v38 = vld [vmem:[#allocation66_spill] sm:$0xff] }
 0x4e0   :  { %v1650_v56 = vpop.f32.mrf.mxu2  ;;  %v1663_v52 = vpop.f32.mrf.mxu3 }
 0x4e1   :  { %v1674_v40 = vpop.f32.mrf.mxu0  ;;  %v1687_v26 = vpop.f32.mrf.mxu1  ;;  %v4362_v56 = vld [vmem:[#allocation67_spill] sm:$0xff]  ;;  %v4363_v52 = vld [vmem:[#allocation68_spill] sm:$0xff] }
 0x4e2   :  { %v1675_v36 = vadd.f32 %v1674_v40, %v1662_v30  ;;  %v4364_v30 = vld [vmem:[#allocation69_spill] sm:$0xff]  ;;  %v4365_v40 = vld [vmem:[#allocation70_spill] sm:$0xff] }
 0x4e4   :  { %v1688_v35 = vadd.f32 %v1687_v26, %v1675_v36  ;;  %v4366_v26 = vld [vmem:[#allocation71_spill] sm:$0xff]  ;;  %v4367_v36 = vld [vmem:[#allocation72_spill] sm:$0xff] }
 0x4e8   :  { %v1700_v25 = vpop.f32.mrf.mxu2  ;;  %v1713_v53 = vpop.f32.mrf.mxu3 }
 0x4e9   :  { %v1701_v20 = vadd.f32 %v1700_v25, %v1688_v35  ;;  %v1676_v59 = vpop.f32.mrf.mxu0  ;;  %v1689_v57 = vpop.f32.mrf.mxu1  ;;  %v4368_v35 = vld [vmem:[#allocation73_spill] sm:$0xff]  ;;  %v4369_v25 = vld [vmem:[#allocation74_spill] sm:$0xff] }
 0x4ea   :  { %v4372_v59 = vld [vmem:[#allocation77_spill] sm:$0xff]  ;;  %v4373_v57 = vld [vmem:[#allocation78_spill] sm:$0xff] }
 0x4eb   :  { %v1714_v55 = vadd.f32 %v1713_v53, %v1701_v20  ;;  %v4370_v53 = vld [vmem:[#allocation75_spill] sm:$0xff]  ;;  %v4371_v20 = vld [vmem:[#allocation76_spill] sm:$0xff] }
 0x4ed   :  { %v1717_v4 = vsel %vm277_vm3, %v1714_v55, -inf  ;;  %v4374_v55 = vld [vmem:[#allocation79_spill] sm:$0xff] }
 0x4ee   :  { %v1718_v6 = vsel %vm801_vm0, %v1717_v4, -inf }
 0x4ef   :  { %1719 = vmax.xlane.f32.xlu1 %v1718_v6  ;;  %v4376_v6 = vld [vmem:[#allocation81_spill] sm:$0xff] }
 0x4f0   :  { %v1702_v10 = vpop.f32.mrf.mxu2  ;;  %v1715_v11 = vpop.f32.mrf.mxu3 }
 0x4f1   :  { %v4377_v10 = vld [vmem:[#allocation82_spill] sm:$0xff]  ;;  %v4378_v11 = vld [vmem:[#allocation83_spill] sm:$0xff] }
 0x562   :  { %v1720_v17 = vpop.xlane.xlu1 %1719 }
 0x563   :  { %v1721_v22 = vsub.f32 %v1717_v4, %v1720_v17  ;;  %v4375_v4 = vld [vmem:[#allocation80_spill] sm:$0xff] }
 0x564   :  { %v4379_v17 = vld [vmem:[#allocation84_spill] sm:$0xff] }
 0x565   :  { %v1722_v23 = vmul.f32 1.442695, %v1721_v22  ;;  %v4380_v22 = vld [vmem:[#allocation85_spill] sm:$0xff] }
 0x567   :  { %2799 = vpow2.f32 %v1722_v23  ;;  %v4381_v23 = vld [vmem:[#allocation86_spill] sm:$0xff] }
 0x56d   :  { %v2800_v27 = vpop.eup %2799 }
 0x56e   :  { %v1724_v37 = vsel %vm801_vm0, %v2800_v27, 0.0 }
 0x56f   :  { %1725 = vadd.xlane.f32.xlu2 %v1724_v37  ;;  %v4383_v37 = vld [vmem:[#allocation88_spill] sm:$0xff] }
 0x5e2   :  { %v1726_v41 = vpop.xlane.xlu2 %1725 }
 0x5e3   :  { %2801 = vrcp.f32 %v1726_v41  ;;  %v1738_v61 = vand.u32 2147483648, %v1726_v41  ;;  %v1736_v32 = vand.u32 2147483647, %v1726_v41  ;;  %vm1732_vm11 = vweird.f32 %v1726_v41 }
 0x5e5   :  { %v1739_v9 = vor.u32 1.1754944e-38, %v1738_v61  ;;  %vm1737_vm13 = vcmp.eq.f32.partialorder %v1736_v32, 8.507059e+37  ;;  %v4388_v61 = vld [vmem:[#allocation93_spill] sm:$0xff]  ;;  %v4390_v32 = vld [vmem:[#allocation95_spill] sm:$0xff] }
 0x5e9   :  { %v2802_v46 = vpop.eup %2801 }
 0x5ea   :  { %v1728_v47 = vmul.f32 %v2802_v46, %v1726_v41  ;;  %vm1733_vm10 = vweird.f32 %v2802_v46  ;;  %v4384_v41 = vld [vmem:[#allocation89_spill] sm:$0xff] }
 0x5eb   :  { %vm1734_vm12 = vmor %vm1732_vm11, %vm1733_vm10 }
 0x5ec   :  { %v1729_v16 = vsub.f32 1.0, %v1728_v47  ;;  %v4386_v47 = vld [vmem:[#allocation91_spill] sm:$0xff] }
 0x5ee   :  { %v1730_v62 = vmul.f32 %v2802_v46, %v1729_v16  ;;  %v4387_v16 = vld [vmem:[#allocation92_spill] sm:$0xff] }
 0x5f0   :  { %v1731_v0 = vadd.f32 %v2802_v46, %v1730_v62  ;;  %v4389_v62 = vld [vmem:[#allocation94_spill] sm:$0xff] }
 0x5f2   :  { %v1735_v13 = vsel %vm1734_vm12, %v2802_v46, %v1731_v0  ;;  %v4385_v46 = vld [vmem:[#allocation90_spill] sm:$0xff]  ;;  %v4391_v0 = vld [vmem:[#allocation96_spill] sm:$0xff] }
 0x5f3   :  { %v1740_v14 = vsel %vm1737_vm13, %v1739_v9, %v1735_v13  ;;  %v4392_v9 = vld [vmem:[#allocation97_spill] sm:$0xff]  ;;  %v4393_v13 = vld [vmem:[#allocation98_spill] sm:$0xff] }
 0x5f4   :  { %v1741_v24 = vmul.f32 %v2800_v27, %v1740_v14  ;;  %v4382_v27 = vld [vmem:[#allocation87_spill] sm:$0xff] }
 0x5f5   :  { %v4394_v14 = vld [vmem:[#allocation99_spill] sm:$0xff] }
 0x5f6   :  { %v1742_v44 = vmul.f32 %v1741_v24, %v4342_v43 }
 0x5f8   :  { %v1743_v48 = vsel %vm801_vm0, %v1742_v44, 0.0  ;;  %v4397_v44 = vld [vmem:[#allocation102_spill] sm:$0xff] }
 0x5f9   :  { %1744 = vadd.xlane.f32.xlu0 %v1743_v48  ;;  %v4398_v48 = vld [vmem:[#allocation103_spill] sm:$0xff] }
 0x66c   :  { %v1745_v31 = vpop.xlane.xlu0 %1744 }
 0x66d   :  { %v1746_v54 = vsub.f32 %v4342_v43, %v1745_v31  ;;  %v4396_v43 = vld [vmem:[#allocation101_spill] sm:$0xff]  ;;  %v4399_v31 = vld [vmem:[#allocation104_spill] sm:$0xff] }
 0x66f   :  { %v1747_v1 = vmul.f32 %v1746_v54, %v1741_v24  ;;  %v4395_v24 = vld [vmem:[#allocation100_spill] sm:$0xff]  ;;  %v4400_v54 = vld [vmem:[#allocation105_spill] sm:$0xff] }
 0x671   :  { %v1748_v2 = vpack.c.bf16 %v1747_v1, %v1747_v1  ;;  %v4401_v1 = vld [vmem:[#allocation106_spill] sm:$0xff] }
 0x673   :  { %1757 = vmatmul.bf16.vlgmr.msra.gmra.mxu0 %v1748_v2  ;;  %1770 = vmatmul.bf16.vlgmr.msra.gmra.mxu1 %v1748_v2 }
 0x674   :  { %1783 = vmatmul.bf16.vlgmr.msra.gmra.mxu2 %v1748_v2  ;;  %1796 = vmatmul.bf16.vlgmr.msra.gmra.mxu3 %v1748_v2 }
 0x675   :  { %1966 = vmatpush.bf16.msra.mxu0 %v4343_v18  ;;  %1979 = vmatpush.bf16.msra.mxu1 %v4344_v39  ;;  %v4403_v18 = vld [vmem:[#allocation108_spill] sm:$0xff]  ;;  %v4404_v39 = vld [vmem:[#allocation109_spill] sm:$0xff] }
 0x676   :  { %1992 = vmatpush.bf16.msra.mxu2 %v4345_v45  ;;  %2005 = vmatpush.bf16.msra.mxu3 %v4346_v33  ;;  %v4405_v45 = vld [vmem:[#allocation110_spill] sm:$0xff]  ;;  %v4406_v33 = vld [vmem:[#allocation111_spill] sm:$0xff] }
 0x679   :  { %1967 = vmatpush.bf16.msra.mxu0 %v4347_v29  ;;  %1980 = vmatpush.bf16.msra.mxu1 %v4348_v51 }
 0x67a   :  { %1993 = vmatpush.bf16.msra.mxu2 %v4349_v28  ;;  %2006 = vmatpush.bf16.msra.mxu3 %v4350_v42 }
 0x67d   :  { %1968 = vmatpush.bf16.msra.mxu0 %v4351_v15  ;;  %1981 = vmatpush.bf16.msra.mxu1 %v4352_v58 }
 0x67e   :  { %1994 = vmatpush.bf16.msra.mxu2 %v4353_v49  ;;  %2007 = vmatpush.bf16.msra.mxu3 %v4354_v7 }
 0x681   :  { %1969 = vmatpush.bf16.msra.mxu0 %v4355_v19  ;;  %1982 = vmatpush.bf16.msra.mxu1 %v4356_v21 }
 0x682   :  { %1995 = vmatpush.bf16.msra.mxu2 %v4357_v34  ;;  %2008 = vmatpush.bf16.msra.mxu3 %v4358_v60 }
 0x683   :  { %1809 = vmatmul.bf16.vlgmr.msrb.gmra.mxu0 %v1748_v2  ;;  %1822 = vmatmul.bf16.vlgmr.msrb.gmra.mxu1 %v1748_v2 }
 0x684   :  { %1835 = vmatmul.bf16.vlgmr.msrb.gmra.mxu2 %v1748_v2  ;;  %1848 = vmatmul.bf16.vlgmr.msrb.gmra.mxu3 %v1748_v2  ;;  %v4402_v2 = vld [vmem:[#allocation107_spill] sm:$0xff] }
 0x685   :  { %1970 = vmatpush.bf16.msra.mxu0 %v4359_v63  ;;  %1983 = vmatpush.bf16.msra.mxu1 %v4360_v12 }
 0x686   :  { %1996 = vmatpush.bf16.msra.mxu2 %v4361_v38  ;;  %2009 = vmatpush.bf16.msra.mxu3 %v4362_v56 }
 0x689   :  { %1971 = vmatpush.bf16.msra.mxu0 %v4363_v52  ;;  %1984 = vmatpush.bf16.msra.mxu1 %v4364_v30 }
 0x68a   :  { %1997 = vmatpush.bf16.msra.mxu2 %v4365_v40  ;;  %2010 = vmatpush.bf16.msra.mxu3 %v4366_v26 }
 0x68d   :  { %1972 = vmatpush.bf16.msra.mxu0 %v4367_v36  ;;  %1985 = vmatpush.bf16.msra.mxu1 %v4368_v35 }
 0x68e   :  { %1998 = vmatpush.bf16.msra.mxu2 %v4369_v25  ;;  %2011 = vmatpush.bf16.msra.mxu3 %v4370_v53 }
 0x691   :  { %1973 = vmatpush.bf16.msra.mxu0 %v4371_v20  ;;  %1986 = vmatpush.bf16.msra.mxu1 %v4372_v59 }
 0x692   :  { %1999 = vmatpush.bf16.msra.mxu2 %v4373_v57  ;;  %2012 = vmatpush.bf16.msra.mxu3 %v4374_v55 }
 0x695   :  { %2018 = vmatpush.bf16.msrb.mxu0 %v4375_v4  ;;  %2031 = vmatpush.bf16.msrb.mxu1 %v4376_v6 }
 0x696   :  { %2044 = vmatpush.bf16.msrb.mxu2 %v4377_v10  ;;  %2057 = vmatpush.bf16.msrb.mxu3 %v4378_v11 }
 0x699   :  { %2019 = vmatpush.bf16.msrb.mxu0 %v4379_v17  ;;  %2032 = vmatpush.bf16.msrb.mxu1 %v4380_v22 }
 0x69a   :  { %2045 = vmatpush.bf16.msrb.mxu2 %v4381_v23  ;;  %2058 = vmatpush.bf16.msrb.mxu3 %v4382_v27 }
 0x69d   :  { %2020 = vmatpush.bf16.msrb.mxu0 %v4383_v37  ;;  %2033 = vmatpush.bf16.msrb.mxu1 %v4384_v41 }
 0x69e   :  { %2046 = vmatpush.bf16.msrb.mxu2 %v4385_v46  ;;  %2059 = vmatpush.bf16.msrb.mxu3 %v4386_v47 }
 0x6a1   :  { %2021 = vmatpush.bf16.msrb.mxu0 %v4387_v16  ;;  %2034 = vmatpush.bf16.msrb.mxu1 %v4388_v61 }
 0x6a2   :  { %2047 = vmatpush.bf16.msrb.mxu2 %v4389_v62  ;;  %2060 = vmatpush.bf16.msrb.mxu3 %v4390_v32 }
 0x6a5   :  { %2022 = vmatpush.bf16.msrb.mxu0 %v4391_v0  ;;  %2035 = vmatpush.bf16.msrb.mxu1 %v4392_v9 }
 0x6a6   :  { %2048 = vmatpush.bf16.msrb.mxu2 %v4393_v13  ;;  %2061 = vmatpush.bf16.msrb.mxu3 %v4394_v14 }
 0x6a9   :  { %2023 = vmatpush.bf16.msrb.mxu0 %v4395_v24  ;;  %2036 = vmatpush.bf16.msrb.mxu1 %v4396_v43 }
 0x6aa   :  { %2049 = vmatpush.bf16.msrb.mxu2 %v4397_v44  ;;  %2062 = vmatpush.bf16.msrb.mxu3 %v4398_v48 }
 0x6ad   :  { %2024 = vmatpush.bf16.msrb.mxu0 %v4399_v31  ;;  %2037 = vmatpush.bf16.msrb.mxu1 %v4400_v54 }
 0x6ae   :  { %2050 = vmatpush.bf16.msrb.mxu2 %v4401_v1  ;;  %2063 = vmatpush.bf16.msrb.mxu3 %v4402_v2 }
 0x6b1   :  { %2025 = vmatpush.bf16.msrb.mxu0 %v4403_v18  ;;  %2038 = vmatpush.bf16.msrb.mxu1 %v4404_v39 }
 0x6b2   :  { %2051 = vmatpush.bf16.msrb.mxu2 %v4405_v45  ;;  %2064 = vmatpush.bf16.msrb.mxu3 %v4406_v33 }
 0x6f0   :  { %v4010_v29 = vpop.f32.mrf.mxu0  ;;  %v4012_v51 = vpop.f32.mrf.mxu1 }
 0x6f1   :  { %v1853_v28 = vmul.f32 %v4010_v29, %v4010_v29  ;;  %v1854_v42 = vmul.f32 %v4012_v51, %v4012_v51 }
 0x6f3   :  { %v1861_v21 = vsel %vm801_vm0, %v1853_v28, 0.0  ;;  %v1862_v34 = vsel %vm801_vm0, %v1854_v42, 0.0 }
 0x6f4   :  { %v1863_v63 = vadd.f32 %v1862_v34, %v1861_v21 }
 0x6f7   :  { %v4018_v15 = vpop.f32.mrf.mxu2  ;;  %v4020_v58 = vpop.f32.mrf.mxu3 }
 0x6f8   :  { %v1855_v49 = vmul.f32 %v4018_v15, %v4018_v15  ;;  %v1760_v7 = vpop.f32.mrf.mxu0  ;;  %v1773_v19 = vpop.f32.mrf.mxu1  ;;  %v1856_v12 = vmul.f32 %v4020_v58, %v4020_v58 }
 0x6fa   :  { %v1864_v60 = vsel %vm801_vm0, %v1855_v49, 0.0  ;;  %v1866_v36 = vsel %vm801_vm0, %v1856_v12, 0.0 }
 0x6fb   :  { %v1865_v38 = vadd.f32 %v1864_v60, %v1863_v63 }
 0x6fd   :  { %v1867_v35 = vadd.f32 %v1866_v36, %v1865_v38 }
 0x6ff   :  { %v1786_v56 = vpop.f32.mrf.mxu2  ;;  %v1799_v52 = vpop.f32.mrf.mxu3 }
 0x700   :  { %v4029_v30 = vpop.f32.mrf.mxu0  ;;  %v1823_v40 = vpop.f32.mrf.mxu1 }
 0x701   :  { %v1857_v26 = vmul.f32 %v4029_v30, %v4029_v30  ;;  %v1858_v53 = vmul.f32 %v1823_v40, %v1823_v40 }
 0x703   :  { %v1868_v25 = vsel %vm801_vm0, %v1857_v26, 0.0  ;;  %v1870_v55 = vsel %vm801_vm0, %v1858_v53, 0.0 }
 0x704   :  { %v1869_v20 = vadd.f32 %v1868_v25, %v1867_v35 }
 0x706   :  { %v1871_v17 = vadd.f32 %v1870_v55, %v1869_v20 }
 0x707   :  { %v1836_v59 = vpop.f32.mrf.mxu2  ;;  %v1849_v57 = vpop.f32.mrf.mxu3 }
 0x708   :  { %v1859_v4 = vmul.f32 %v1836_v59, %v1836_v59  ;;  %v1860_v6 = vmul.f32 %v1849_v57, %v1849_v57  ;;  %v1812_v10 = vpop.f32.mrf.mxu0  ;;  %v1825_v11 = vpop.f32.mrf.mxu1 }
 0x70a   :  { %v1872_v22 = vsel %vm801_vm0, %v1859_v4, 0.0  ;;  %v1874_v27 = vsel %vm801_vm0, %v1860_v6, 0.0 }
 0x70b   :  { %v1873_v23 = vadd.f32 %v1872_v22, %v1871_v17 }
 0x70d   :  { %v1875_v37 = vadd.f32 %v1874_v27, %v1873_v23 }
 0x70f   :  { %v1838_v41 = vpop.f32.mrf.mxu2  ;;  %v1851_v46 = vpop.f32.mrf.mxu3  ;;  %1876 = vadd.xlane.f32.xlu1 %v1875_v37 }
 0x782   :  { %v1877_v47 = vpop.xlane.xlu1 %1876 }
 0x783   :  { %2803 = vrsqrt.f32 %v1877_v47  ;;  %vm1885_vm14 = vcmp.eq.f32.partialorder %v1877_v47, inf  ;;  %v1888_v14 = vand.u32 2147483648, %v1877_v47  ;;  %vm1887_vm15 = vcmp.eq.f32.partialorder %v1877_v47, 0.0 }
 0x789   :  { %v2804_v16 = vpop.eup %2803 }
 0x78a   :  { %v1879_v61 = vmul.f32 %v2804_v16, %v1877_v47 }
 0x78c   :  { %v1880_v62 = vmul.f32 %v2804_v16, %v1879_v61 }
 0x78e   :  { %v1881_v32 = vmul.f32 0.5, %v1880_v62 }
 0x790   :  { %v1882_v0 = vsub.f32 1.5, %v1881_v32 }
 0x792   :  { %v1883_v9 = vmul.f32 %v2804_v16, %v1882_v0 }
 0x794   :  { %v1884_v13 = vmul.f32 %v1883_v9, %v1877_v47 }
 0x796   :  { %v1886_v24 = vsel %vm1885_vm14, %v1877_v47, %v1884_v13 }
 0x797   :  { %v1889_v43 = vsel %vm1887_vm15, %v1888_v14, %v1886_v24 }
 0x798   :  { %v1890_v44 = vadd.f32 1e-08, %v1889_v43 }
 0x79a   :  { %2805 = vrcp.f32 %v1890_v44  ;;  %v1902_v1 = vand.u32 2147483648, %v1890_v44  ;;  %v1900_v18 = vand.u32 2147483647, %v1890_v44  ;;  %vm1896_vm2 = vweird.f32 %v1890_v44 }
 0x79c   :  { %v1903_v45 = vor.u32 1.1754944e-38, %v1902_v1  ;;  %vm1901_vm5 = vcmp.eq.f32.partialorder %v1900_v18, 8.507059e+37 }
 0x7a0   :  { %v2806_v48 = vpop.eup %2805 }
 0x7a1   :  { %v1892_v31 = vmul.f32 %v2806_v48, %v1890_v44  ;;  %vm1897_vm1 = vweird.f32 %v2806_v48 }
 0x7a2   :  { %vm1898_vm4 = vmor %vm1896_vm2, %vm1897_vm1 }
 0x7a3   :  { %v1893_v54 = vsub.f32 1.0, %v1892_v31 }
 0x7a5   :  { %v1894_v2 = vmul.f32 %v2806_v48, %v1893_v54 }
 0x7a7   :  { %v1895_v39 = vadd.f32 %v2806_v48, %v1894_v2 }
 0x7a9   :  { %v1899_v33 = vsel %vm1898_vm4, %v2806_v48, %v1895_v39 }
 0x7aa   :  { %v1904_v28 = vsel %vm1901_vm5, %v1903_v45, %v1899_v33 }
 0x7ab   :  { %v1906_v42 = vmul.f32 %v1904_v28, %v4012_v51  ;;  %v1907_v49 = vmul.f32 %v1904_v28, %v4018_v15  ;;  %v1908_v7 = vmul.f32 %v1904_v28, %v4020_v58  ;;  %v1910_v19 = vmul.f32 %v1904_v28, %v1823_v40 }
 0x7ac   :  { %v1911_v21 = vmul.f32 %v1904_v28, %v1836_v59  ;;  %v1912_v34 = vmul.f32 %v1904_v28, %v1849_v57  ;;  %v1905_v60 = vmul.f32 %v1904_v28, %v4010_v29  ;;  %v1909_v56 = vmul.f32 %v1904_v28, %v4029_v30 }
 0x7ad   :  { %v1921_v63 = vrot.slane %v1906_v42, 6  ;;  %v1922_v12 = vrot.slane %v1907_v49, 4  ;;  %v1923_v38 = vrot.slane %v1908_v7, 2  ;;  %v1924_v52 = vrot.slane %v1910_v19, 6 }
 0x7ae   :  { %v1925_v26 = vrot.slane %v1911_v21, 4  ;;  %v1926_v36 = vrot.slane %v1912_v34, 2 }
 0x7af   :  { %v1927_v35 = vsel %vm801_vm0, %v1905_v60, %v1921_v63  ;;  %v1928_v51 = vsel %vm1573_vm8, %v1922_v12, %v1923_v38  ;;  %v1930_v58 = vsel %vm801_vm0, %v1909_v56, %v1924_v52  ;;  %v4407_v63 = vld [vmem:[#allocation19_spill] sm:$0xff] }
 0x7b0   :  { %v1929_v15 = vsel %vm1575_vm9, %v1927_v35, %v1928_v51  ;;  %v1931_v40 = vsel %vm1573_vm8, %v1925_v26, %v1926_v36  ;;  %v826_v12 = vsel %vm277_vm3, %v4407_v63, 1.0 }
 0x7b1   :  { %v1932_v29 = vsel %vm1575_vm9, %v1930_v58, %v1931_v40  ;;  %v1935_v25 = vadd.f32 %v1929_v15, %v4207_v3 }
 0x7b2   :  { %v1936_v53 = vadd.f32 %v1932_v29, %v4208_v5 }
 0x7b3   :  { %1939 = vst [vmem:[#allocation1] ss:$4 sm:$0xff] %v1935_v25 }
 0x7b4   :  { %1941 = vst [vmem:[#allocation1 + $0x20] ss:$4 sm:$0xff] %v1936_v53 }
 0x7ba   :  { %v1942_v30 = vld.sshfl [vmem:[#allocation1] sm:$0xff pattern:$0x73625140]  ;;  %v1943_v20 = vld.sshfl [vmem:[#allocation1 + $0x8] sm:$0xff pattern:$0x73625140] }
 0x7bb   :  { %v1958_v59 = vpack.c.bf16 %v1942_v30, %v1942_v30  ;;  %v1959_v57 = vpack.c.bf16 %v1943_v20, %v1943_v20  ;;  %v1944_v55 = vld.sshfl [vmem:[#allocation1 + $0x10] sm:$0xff pattern:$0x73625140]  ;;  %v1945_v4 = vld.sshfl [vmem:[#allocation1 + $0x18] sm:$0xff pattern:$0x73625140] }
 0x7bc   :  { %v1960_v6 = vpack.c.bf16 %v1944_v55, %v1944_v55  ;;  %v1961_v10 = vpack.c.bf16 %v1945_v4, %v1945_v4  ;;  %v1946_v11 = vld.sshfl [vmem:[#allocation1 + $0x20] sm:$0xff pattern:$0x73625140]  ;;  %v1947_v17 = vld.sshfl [vmem:[#allocation1 + $0x28] sm:$0xff pattern:$0x73625140] }
 0x7bd   :  { %1974 = vmatmul.bf16.vlgmr.msra.gmra.mxu0 %v1958_v59  ;;  %1987 = vmatmul.bf16.vlgmr.msra.gmra.mxu1 %v1959_v57  ;;  %v1948_v22 = vld.sshfl [vmem:[#allocation1 + $0x30] sm:$0xff pattern:$0x73625140]  ;;  %v1949_v3 = vld.sshfl [vmem:[#allocation1 + $0x38] sm:$0xff pattern:$0x73625140]  ;;  %v1962_v23 = vpack.c.bf16 %v1946_v11, %v1946_v11  ;;  %v1963_v5 = vpack.c.bf16 %v1947_v17, %v1947_v17 }
 0x7be   :  { %2000 = vmatmul.bf16.vlgmr.msra.gmra.mxu2 %v1960_v6  ;;  %2013 = vmatmul.bf16.vlgmr.msra.gmra.mxu3 %v1961_v10  ;;  %v1964_v27 = vpack.c.bf16 %v1948_v22, %v1948_v22  ;;  %v1965_v37 = vpack.c.bf16 %v1949_v3, %v1949_v3 }
 0x7cd   :  { %2026 = vmatmul.bf16.vlgmr.msrb.gmra.mxu0 %v1962_v23  ;;  %2039 = vmatmul.bf16.vlgmr.msrb.gmra.mxu1 %v1963_v5 }
 0x7ce   :  { %2052 = vmatmul.bf16.vlgmr.msrb.gmra.mxu2 %v1964_v27  ;;  %2065 = vmatmul.bf16.vlgmr.msrb.gmra.mxu3 %v1965_v37 }
 0x83a   :  { %v1975_v41 = vpop.f32.mrf.mxu0  ;;  %v1988_v46 = vpop.f32.mrf.mxu1 }
 0x83b   :  { %v1976_v47 = vadd.f32 %v3936_v50, %v1975_v41 }
 0x83d   :  { %v1989_v0 = vadd.f32 %v1988_v46, %v1976_v47 }
 0x841   :  { %v2001_v16 = vpop.f32.mrf.mxu2  ;;  %v2014_v61 = vpop.f32.mrf.mxu3 }
 0x842   :  { %v1977_v62 = vpop.f32.mrf.mxu0  ;;  %v1990_v32 = vpop.f32.mrf.mxu1  ;;  %v2002_v9 = vadd.f32 %v2001_v16, %v1989_v0 }
 0x844   :  { %v2015_v24 = vadd.f32 %v2014_v61, %v2002_v9 }
 0x849   :  { %v2003_v13 = vpop.f32.mrf.mxu2  ;;  %v2016_v14 = vpop.f32.mrf.mxu3 }
 0x84a   :  { %v2027_v43 = vpop.f32.mrf.mxu0  ;;  %v2040_v44 = vpop.f32.mrf.mxu1 }
 0x84b   :  { %v2028_v48 = vadd.f32 %v2027_v43, %v2015_v24 }
 0x84d   :  { %v2041_v31 = vadd.f32 %v2040_v44, %v2028_v48 }
 0x851   :  { %v2053_v54 = vpop.f32.mrf.mxu2  ;;  %v2066_v1 = vpop.f32.mrf.mxu3 }
 0x852   :  { %v2054_v2 = vadd.f32 %v2053_v54, %v2041_v31  ;;  %v2029_v18 = vpop.f32.mrf.mxu0  ;;  %v2042_v39 = vpop.f32.mrf.mxu1 }
 0x854   :  { %v2067_v45 = vadd.f32 %v2066_v1, %v2054_v2 }
 0x856   :  { %v2070_v50 = vsel %vm277_vm3, %v2067_v45, -inf  ;;  %vm2109_vm3 = vcmask 0  }
 0x857   :  { %v2071_v33 = vsel %vm801_vm0, %v2070_v50, -inf }
 0x858   :  { %2072 = vmax.xlane.f32.xlu2 %v2071_v33 }
 0x859   :  { %v2055_v28 = vpop.f32.mrf.mxu2  ;;  %v2068_v42 = vpop.f32.mrf.mxu3 }
 0x8cb   :  { %v2073_v49 = vpop.xlane.xlu2 %2072 }
 0x8cc   :  { %v2074_v7 = vsub.f32 %v2070_v50, %v2073_v49 }
 0x8ce   :  { %v2075_v19 = vmul.f32 1.442695, %v2074_v7 }
 0x8d0   :  { %2807 = vpow2.f32 %v2075_v19 }
 0x8d6   :  { %v2808_v21 = vpop.eup %2807 }
 0x8d7   :  { %v2077_v34 = vsel %vm801_vm0, %v2808_v21, 0.0 }
 0x8d8   :  { %2078 = vadd.xlane.f32.xlu0 %v2077_v34 }
 0x94b   :  { %v2079_v60 = vpop.xlane.xlu0 %2078 }
 0x94c   :  { %2809 = vrcp.f32 %v2079_v60  ;;  %v2091_v26 = vand.u32 2147483648, %v2079_v60  ;;  %v2089_v35 = vand.u32 2147483647, %v2079_v60  ;;  %vm2085_vm7 = vweird.f32 %v2079_v60 }
 0x94d   :  { %2811 = vlog2.f32 %v826_v12 }
 0x94e   :  { %v2092_v58 = vor.u32 1.1754944e-38, %v2091_v26  ;;  %vm2090_vm9 = vcmp.eq.f32.partialorder %v2089_v35, 8.507059e+37 }
 0x952   :  { %v2810_v38 = vpop.eup %2809 }
 0x953   :  { %v2081_v56 = vmul.f32 %v2810_v38, %v2079_v60  ;;  %vm2086_vm6 = vweird.f32 %v2810_v38  ;;  %v2812_v15 = vpop.eup %2811 }
 0x954   :  { %vm2087_vm8 = vmor %vm2085_vm7, %vm2086_vm6  ;;  %v828_v25 = vmul.f32 0.6931472, %v2812_v15 }
 0x955   :  { %v2082_v52 = vsub.f32 1.0, %v2081_v56 }
 0x957   :  { %v2083_v36 = vmul.f32 %v2810_v38, %v2082_v52 }
 0x959   :  { %v2084_v51 = vadd.f32 %v2810_v38, %v2083_v36 }
 0x95b   :  { %v2088_v40 = vsel %vm2087_vm8, %v2810_v38, %v2084_v51 }
 0x95c   :  { %v2093_v29 = vsel %vm2090_vm9, %v2092_v58, %v2088_v40 }
 0x95d   :  { %v2094_v53 = vmul.f32 %v2808_v21, %v2093_v29 }
 0x95f   :  { %v2095_v8 = vsub.f32 %v828_v25, %v2094_v53 }
 0x961   :  { %v2096_v30 = vmul.f32 %v2095_v8, %v4407_v63 }
 0x963   :  { %v2097_v20 = vsel %vm801_vm0, %v2096_v30, 0.0 }
 0x964   :  { %2098 = vadd.xlane.f32.xlu1 %v2097_v20 }
 0x9d7   :  { %v2099_v59 = vpop.xlane.xlu1 %2098 }
 0x9d8   :  { %v2100_v57 = vrot.slane %v2099_v59, 4 }
 0x9da   :  { %v2101_v55 = vadd.f32 %v2100_v57, %v2099_v59 }
 0x9dc   :  { %v2102_v4 = vrot.slane %v2101_v55, 2 }
 0x9de   :  { %v2103_v6 = vadd.f32 %v2102_v4, %v2101_v55 }
 0x9e0   :  { %v2104_v10 = vrot.slane %v2103_v6, 1 }
 0x9e2   :  { %v2105_v11 = vadd.f32 %v2104_v10, %v2103_v6 }
 0x9e4   :  { %2770 = vpush %v2105_v11 }
 0xa15   :  { %s2771_s21 = spop %2770 }
 0xa16   :  { %v2107_v17 = vstv %s2771_s21 }
 0xa17   :  { %v2108_v22 = vmul.f32 0.05, %v2107_v17 }
 0xa19   :  { %2110 = vst.msk [vmem:[#allocation10] sm:$0x1] %vm2109_vm3, %v2108_v22 }
 0xa1a   :  { %2121 = dma.vmem_to_hbm [thread:$0]  %s2117_s17, 16, %s2119_s20, [#allocation4]  }
 0xa1b   :  { %3004 = dma.done.wait [#allocation4], 16  }
 0xa1c   :  { %3005 = vsyncadd [#allocation4], 4294967280 }
 0xa1d   :  { %2126 = vsyncpa [#allocation3], 1 }
 0xa1e   :  { %2127 = vsyncpa [#allocation6], 1 }
 0xa1f   :  { %2128 = vsyncpa [#allocation9], 1 }
 0xa20   :  { %2129 = vsyncpa [#allocation4], 1 }

</bundles_post_ra>
